<compile_context>
chip_gen: v7x
topology: tpu7x:2x2x1
jax: 0.10.0
libtpu: 0.0.40
codegen_flags: <defaults>
</compile_context>

<pallas_src>
import jax
import jax.numpy as jnp
from jax import lax
from jax.experimental import pallas as pl
from jax.experimental.pallas import tpu as pltpu


# ---------------------------------------------------------------------------
# Fused ResBasicBlock kernel: one image per grid step.
# ---------------------------------------------------------------------------
def _make_block_kernel(s, H, W, Ho, Wo, Cin, Cmid, Cout, has_proj):
    W0 = 8  # sublane-aligned interior-column offset inside padded scratches
    bf16 = jnp.bfloat16

    def kernel(x_ref, wa_ref, ba_ref, wb_ref, bb_ref, out_ref,
               hpad_ref, pa_ref, pb_ref, *maybe_xpad):

        # ---- input taps (zero-padded, stride-s) -----------------------------
        if s == 1:
            (xpad_ref,) = maybe_xpad
            # In-kernel zero padding replaces a wrapper-side HBM pad pass.
            # Interior store + cheap halo re-zero every step (scratch halos
            # cannot be one-time-initialized under a "parallel" grid axis).
            xpad_ref[1:1 + H, W0:W0 + W, :] = x_ref[0]
            zr = jnp.zeros((1, W + 2, Cin), bf16)
            xpad_ref[0:1, W0 - 1:W0 + W + 1, :] = zr
            xpad_ref[H + 1:H + 2, W0 - 1:W0 + W + 1, :] = zr
            zc = jnp.zeros((H, 1, Cin), bf16)
            xpad_ref[1:1 + H, W0 - 1:W0, :] = zc
            xpad_ref[1:1 + H, W0 + W:W0 + W + 1, :] = zc

            def tap(kh, kw):
                return xpad_ref[kh:kh + Ho, W0 - 1 + kw:W0 - 1 + kw + Wo, :]
        else:
            # Input arrives pre-padded and phase-decomposed (s*s phases).
            def tap(kh, kw):
                p = (kh % s) * s + (kw % s)
                oh0, ow0 = kh // s, kw // s
                return x_ref[p, oh0:oh0 + Ho, ow0:ow0 + Wo, :]

        # ---- conv_a (+ fused 1x1 projection): ONE im2col matmul -------------
        for kh in range(3):
            for kw in range(3):
                t = kh * 3 + kw
                pa_ref[:, t * Cin:(t + 1) * Cin] = tap(kh, kw).reshape(Ho * Wo, Cin)
        ab = jnp.dot(pa_ref[...], wa_ref[...],
                     preferred_element_type=jnp.float32) + ba_ref[...]
        h = jnp.maximum(ab[:, :Cmid] if has_proj else ab, 0.0)   # (Ho*Wo, Cmid) f32
        if has_proj:
            res = ab[:, Cmid:]                                   # (Ho*Wo, Cout) f32
        else:
            # identity residual (no-proj implies s == 1 and Cin == Cout)
            res = x_ref[0].reshape(Ho * Wo, Cout).astype(jnp.float32)

        # ---- stage zero-padded h (bf16) in VMEM; h never touches HBM --------
        hpad_ref[1:1 + Ho, W0:W0 + Wo, :] = h.reshape(Ho, Wo, Cmid).astype(bf16)
        zr = jnp.zeros((1, Wo + 2, Cmid), bf16)
        hpad_ref[0:1, W0 - 1:W0 + Wo + 1, :] = zr
        hpad_ref[Ho + 1:Ho + 2, W0 - 1:W0 + Wo + 1, :] = zr
        zc = jnp.zeros((Ho, 1, Cmid), bf16)
        hpad_ref[1:1 + Ho, W0 - 1:W0, :] = zc
        hpad_ref[1:1 + Ho, W0 + Wo:W0 + Wo + 1, :] = zc

        # ---- conv_b: ONE im2col matmul; + residual; final ReLU --------------
        for kh in range(3):
            for kw in range(3):
                t = kh * 3 + kw
                pb_ref[:, t * Cmid:(t + 1) * Cmid] = (
                    hpad_ref[kh:kh + Ho, W0 - 1 + kw:W0 - 1 + kw + Wo, :]
                    .reshape(Ho * Wo, Cmid))
        acc = jnp.dot(pb_ref[...], wb_ref[...],
                      preferred_element_type=jnp.float32) + bb_ref[...]
        out_ref[0] = jnp.maximum(acc + res, 0.0).astype(out_ref.dtype)

    return kernel


# ---------------------------------------------------------------------------
# Wrapper: one fused pallas_call per ResBasicBlock.
# ---------------------------------------------------------------------------
def res_basic_block(x, q):
    """x: (N, H, W, Cin) bfloat16 NHWC.  q: prepared (BN-folded, im2col) params."""
    N, H, W, Cin = x.shape
    s, Cmid, Cout = q["stride"], q["cmid"], q["cout"]
    CA = q["wa"].shape[1]
    Ho = (H + 2 - 3) // s + 1
    Wo = (W + 2 - 3) // s + 1
    W0 = 8

    if s > 1:
        # pad=1 + pad up to a multiple of s, then phase-decompose ONCE per
        # block (shared by conv_a and the fused projection).
        Hp, Wp = H + 2, W + 2
        Hq, Wq = -(-Hp // s), -(-Wp // s)
        xin = jnp.pad(x, ((0, 0), (1, Hq * s - Hp + 1), (1, Wq * s - Wp + 1), (0, 0)))
        xin = (xin.reshape(N, Hq, s, Wq, s, Cin)
               .transpose(0, 2, 4, 1, 3, 5)
               .reshape(N * s * s, Hq, Wq, Cin))
        x_spec = pl.BlockSpec((s * s, Hq, Wq, Cin), lambda n: (n, 0, 0, 0))
    else:
        # No wrapper-side pad: the kernel stages x into a zero-haloed scratch.
        xin = x
        x_spec = pl.BlockSpec((1, H, W, Cin), lambda n: (n, 0, 0, 0))

    in_specs = [
        x_spec,
        pl.BlockSpec((9 * Cin, CA), lambda n: (0, 0)),
        pl.BlockSpec((1, CA), lambda n: (0, 0)),
        pl.BlockSpec((9 * Cmid, Cout), lambda n: (0, 0)),
        pl.BlockSpec((1, Cout), lambda n: (0, 0)),
    ]
    scratch = [
        pltpu.VMEM((Ho + 2, W0 + Wo + 1, Cmid), jnp.bfloat16),  # zero-padded h
        pltpu.VMEM((Ho * Wo, 9 * Cin), jnp.bfloat16),           # im2col patches (conv_a)
        pltpu.VMEM((Ho * Wo, 9 * Cmid), jnp.bfloat16),          # im2col patches (conv_b)
    ]
    if s == 1:
        scratch.append(pltpu.VMEM((H + 2, W0 + W + 1, Cin), jnp.bfloat16))  # padded x

    kernel = _make_block_kernel(s, H, W, Ho, Wo, Cin, Cmid, Cout, q["proj"])
    out = pl.pallas_call(
        kernel,
        grid=(N,),
        in_specs=in_specs,
        out_specs=pl.BlockSpec((1, Ho * Wo, Cout), lambda n: (n, 0, 0)),
        out_shape=jax.ShapeDtypeStruct((N, Ho * Wo, Cout), jnp.bfloat16),
        scratch_shapes=scratch,
        compiler_params=pltpu.CompilerParams(dimension_semantics=("parallel",)),
    )(xin, q["wa"], q["ba"], q["wb"], q["bb"])
    return out.reshape(N, Ho, Wo, Cout)


# ---------------------------------------------------------------------------
# Parameter preparation: fold inference-BN, reshape to im2col, fuse projection.
# ---------------------------------------------------------------------------
def _fold_bn(p):
    """Fold BN running stats into conv weights (bf16) and per-channel f32 bias."""
    f = {"stride": p["stride"], "proj": p["proj"]}
    f["wa"] = (p["a_w"] * p["a_scale"]).astype(jnp.bfloat16)        # (3,3,Cin,Cmid)
    f["ba"] = p["a_bias"].astype(jnp.float32)
    f["wb"] = (p["b_w"] * p["b_scale"]).astype(jnp.bfloat16)        # (3,3,Cmid,Cout)
    f["bb"] = p["b_bias"].astype(jnp.float32)
    if p["proj"]:
        f["wp"] = (p["proj_w"] * p["proj_scale"]).astype(jnp.bfloat16)  # (1,1,Cin,Cout)
        f["bp"] = p["proj_bias"].astype(jnp.float32)
    return f


def prep_block(p):
    f = _fold_bn(p)
    Cin, Cmid = f["wa"].shape[2], f["wa"].shape[3]
    Cout = f["wb"].shape[3]
    wa = f["wa"].reshape(9 * Cin, Cmid)       # K-order: (kh, kw, cin)
    ba = f["ba"]
    if f["proj"]:
        # Fuse the 1x1 projection into conv_a: extra Cout output columns fed
        # only by the centre-tap ((kh,kw)=(1,1)) rows of the im2col K dim.
        wp = f["wp"][0, 0]                                           # (Cin, Cout)
        wpz = jnp.zeros((9 * Cin, Cout), jnp.bfloat16).at[4 * Cin:5 * Cin].set(wp)
        wa = jnp.concatenate([wa, wpz], axis=1)                      # (9*Cin, Cmid+Cout)
        ba = jnp.concatenate([ba, f["bp"]])
    return {
        "stride": f["stride"], "proj": f["proj"],
        "cin": Cin, "cmid": Cmid, "cout": Cout,
        "wa": wa, "ba": ba.reshape(1, -1),
        "wb": f["wb"].reshape(9 * Cmid, Cout),
        "bb": f["bb"].reshape(1, -1),
    }


def any_stage(x_nchw, params):
    x = jnp.transpose(x_nchw, (0, 2, 3, 1)).astype(jnp.bfloat16)   # NCHW -> NHWC, bf16
    for p in params:
        x = res_basic_block(x, prep_block(p))
    # final output back to f32 NCHW to match the PyTorch module's layout
    return jnp.transpose(x, (0, 3, 1, 2)).astype(jnp.float32)


# ---------------------------------------------------------------------------
# Deterministic parameter init (shapes implied by the module's __init__).
# ---------------------------------------------------------------------------
def _init_bn(key, c):
    k1, k2, k3, k4 = jax.random.split(key, 4)
    gamma = 1.0 + 0.1 * jax.random.normal(k1, (c,), jnp.float32)
    beta = 0.1 * jax.random.normal(k2, (c,), jnp.float32)
    mean = 0.1 * jax.random.normal(k3, (c,), jnp.float32)
    var = 1.0 + 0.1 * jnp.abs(jax.random.normal(k4, (c,), jnp.float32))
    eps = 1e-5
    scale = gamma / jnp.sqrt(var + eps)
    bias = beta - mean * scale
    return scale, bias


def _init_conv(key, k, cin, cout):
    fan_in = k * k * cin
    return jax.random.normal(key, (k, k, cin, cout), jnp.float32) * (2.0 / fan_in) ** 0.5


def init_block(key, w_in, w_out, stride):
    ks = jax.random.split(key, 6)
    p = {"stride": stride, "proj": (w_in != w_out) or (stride != 1)}
    if p["proj"]:
        p["proj_w"] = _init_conv(ks[0], 1, w_in, w_out)
        p["proj_scale"], p["proj_bias"] = _init_bn(ks[1], w_out)
    p["a_w"] = _init_conv(ks[2], 3, w_in, w_out)
    p["a_scale"], p["a_bias"] = _init_bn(ks[3], w_out)
    p["b_w"] = _init_conv(ks[4], 3, w_out, w_out)
    p["b_scale"], p["b_bias"] = _init_bn(ks[5], w_out)
    return p


# ---------------------------------------------------------------------------
# References: (a) block-level reference with IDENTICAL numerics to the kernel
#             (bf16 operands/activations, f32 accumulate), used with teacher
#             forcing; (b) full-f32 HIGHEST-precision model (loose check).
# ---------------------------------------------------------------------------
_DN = ("NHWC", "HWIO", "NHWC")


def _block_matched_ref(x, f):
    s = f["stride"]
    a = lax.conv_general_dilated(x, f["wa"], (s, s), [(1, 1), (1, 1)],
                                 dimension_numbers=_DN,
                                 preferred_element_type=jnp.float32) + f["ba"]
    h = jnp.maximum(a, 0.0).astype(jnp.bfloat16)
    b = lax.conv_general_dilated(h, f["wb"], (1, 1), [(1, 1), (1, 1)],
                                 dimension_numbers=_DN,
                                 preferred_element_type=jnp.float32) + f["bb"]
    if f["proj"]:
        res = lax.conv_general_dilated(x, f["wp"], (s, s), [(0, 0), (0, 0)],
                                       dimension_numbers=_DN,
                                       preferred_element_type=jnp.float32) + f["bp"]
    else:
        res = x.astype(jnp.float32)
    return jnp.maximum(b + res, 0.0).astype(jnp.bfloat16)


def _conv_f32(x, w, stride, pad):
    return lax.conv_general_dilated(
        x, w, (stride, stride), [(pad, pad), (pad, pad)],
        dimension_numbers=_DN, precision=lax.Precision.HIGHEST)


def _block_f32_ref(x, p):
    s = p["stride"]
    if p["proj"]:
        res = _conv_f32(x, p["proj_w"], s, 0) * p["proj_scale"] + p["proj_bias"]
    else:
        res = x
    h = jnp.maximum(_conv_f32(x, p["a_w"], s, 1) * p["a_scale"] + p["a_bias"], 0.0)
    f = _conv_f32(h, p["b_w"], 1, 1) * p["b_scale"] + p["b_bias"]
    return jnp.maximum(res + f, 0.0)


def any_stage_f32_ref(x_nchw, params):
    x = jnp.transpose(x_nchw, (0, 2, 3, 1))
    for p in params:
        x = _block_f32_ref(x, p)
    return jnp.transpose(x, (0, 3, 1, 2))


if __name__ == "__main__":
    # AnyStage(w_in=4, w_out=8, stride=2, d=2, block_fun=ResBasicBlock, bm=1, gw=1, se_r=None)
    w_in, w_out, stride, d = 4, 8, 2, 2
    key = jax.random.PRNGKey(0)
    kx, kp = jax.random.split(key)
    x = jax.random.normal(kx, (2, w_in, 16, 16), jnp.float32)  # NCHW, like PyTorch input

    pkeys = jax.random.split(kp, d)
    params = [
        init_block(pkeys[i], w_in if i == 0 else w_out, w_out, stride if i == 0 else 1)
        for i in range(d)
    ]

    out = jax.block_until_ready(any_stage(x, params))
    assert out.shape == (2, w_out, 8, 8), out.shape

    # Per-block check against a reference with identical numerics (bf16
    # operands / bf16-carried activations, f32 accumulation), teacher-forcing
    # each block with the kernel's own previous output.
    xk = jnp.transpose(x, (0, 2, 3, 1)).astype(jnp.bfloat16)
    for p in params:
        yk = res_basic_block(xk, prep_block(p))
        yr = _block_matched_ref(xk, _fold_bn(p))
        ykf, yrf = yk.astype(jnp.float32), yr.astype(jnp.float32)
        err_m = float(jnp.max(jnp.abs(ykf - yrf)))
        assert jnp.allclose(ykf, yrf, rtol=1e-2, atol=1e-2), err_m
        xk = yk

    # Loose sanity check of the whole stage against the full-f32 model
    # (bf16 weight + bf16-carried-activation rounding only).
    ref_f = jax.block_until_ready(any_stage_f32_ref(x, params))
    err_f = float(jnp.max(jnp.abs(out - ref_f)))
    assert jnp.allclose(out, ref_f, rtol=1.5e-1, atol=1.5e-1), err_f
    print("KERNEL_OK")
</pallas_src>

<mosaic_0001>
module attributes {stable_mosaic.version = 11 : i64} {
  func.func @kernel(%arg0: i32, %arg1: memref<4x9x9x4xbf16, #tpu.memory_space<vmem>>, %arg2: memref<36x16xbf16, #tpu.memory_space<vmem>>, %arg3: memref<1x16xf32, #tpu.memory_space<vmem>>, %arg4: memref<72x8xbf16, #tpu.memory_space<vmem>>, %arg5: memref<1x8xf32, #tpu.memory_space<vmem>>, %arg6: memref<1x64x8xbf16, #tpu.memory_space<vmem>>, %arg7: memref<10x17x8xbf16, #tpu.memory_space<vmem>>, %arg8: memref<64x36xbf16, #tpu.memory_space<vmem>>, %arg9: memref<64x72xbf16, #tpu.memory_space<vmem>>) attributes {dimension_semantics = [#tpu.dimension_semantics<parallel>], iteration_bounds = array<i64: 2>, scalar_prefetch = 0 : i64, scratch_operands = 3 : i64, tpu.core_type = #tpu.core_type<tc>, window_params = [{transform_indices = @transform_0, window_bounds = array<i64: 4, 9, 9, 4>}, {pipeline_mode = #tpu.pipeline_mode<synchronous>, transform_indices = @transform_1, window_bounds = array<i64: 36, 16>}, {pipeline_mode = #tpu.pipeline_mode<synchronous>, transform_indices = @transform_2, window_bounds = array<i64: 1, 16>}, {pipeline_mode = #tpu.pipeline_mode<synchronous>, transform_indices = @transform_3, window_bounds = array<i64: 72, 8>}, {pipeline_mode = #tpu.pipeline_mode<synchronous>, transform_indices = @transform_4, window_bounds = array<i64: 1, 8>}, {transform_indices = @transform_5, window_bounds = array<i64: 1, 64, 8>}]} {
    %c0 = arith.constant 0 : index
    %c0_0 = arith.constant 0 : index
    %c0_1 = arith.constant 0 : index
    %c0_2 = arith.constant 0 : index
    %0 = vector.load %arg1[%c0, %c0_0, %c0_1, %c0_2] : memref<4x9x9x4xbf16, #tpu.memory_space<vmem>>, vector<1x8x8x4xbf16>
    %1 = vector.shape_cast %0 : vector<1x8x8x4xbf16> to vector<8x8x4xbf16>
    %2 = vector.shape_cast %1 : vector<8x8x4xbf16> to vector<64x4xbf16>
    %c0_3 = arith.constant 0 : index
    %c0_4 = arith.constant 0 : index
    %3 = vector.load %arg8[%c0_3, %c0_4] : memref<64x36xbf16, #tpu.memory_space<vmem>>, vector<64x4xbf16>
    tpu.vector_store %arg8[%c0_3, %c0_4], %2 {strides = array<i32>} : memref<64x36xbf16, #tpu.memory_space<vmem>>, vector<64x4xbf16>,
    %c1 = arith.constant 1 : index
    %c0_5 = arith.constant 0 : index
    %c0_6 = arith.constant 0 : index
    %c0_7 = arith.constant 0 : index
    %4 = vector.load %arg1[%c1, %c0_5, %c0_6, %c0_7] : memref<4x9x9x4xbf16, #tpu.memory_space<vmem>>, vector<1x8x8x4xbf16>
    %5 = vector.shape_cast %4 : vector<1x8x8x4xbf16> to vector<8x8x4xbf16>
    %6 = vector.shape_cast %5 : vector<8x8x4xbf16> to vector<64x4xbf16>
    %c0_8 = arith.constant 0 : index
    %c4 = arith.constant 4 : index
    %7 = vector.load %arg8[%c0_8, %c4] : memref<64x36xbf16, #tpu.memory_space<vmem>>, vector<64x4xbf16>
    tpu.vector_store %arg8[%c0_8, %c4], %6 {strides = array<i32>} : memref<64x36xbf16, #tpu.memory_space<vmem>>, vector<64x4xbf16>,
    %c0_9 = arith.constant 0 : index
    %c0_10 = arith.constant 0 : index
    %c1_11 = arith.constant 1 : index
    %c0_12 = arith.constant 0 : index
    %8 = vector.load %arg1[%c0_9, %c0_10, %c1_11, %c0_12] : memref<4x9x9x4xbf16, #tpu.memory_space<vmem>>, vector<1x8x8x4xbf16>
    %9 = vector.shape_cast %8 : vector<1x8x8x4xbf16> to vector<8x8x4xbf16>
    %10 = vector.shape_cast %9 : vector<8x8x4xbf16> to vector<64x4xbf16>
    %c0_13 = arith.constant 0 : index
    %c8 = arith.constant 8 : index
    %11 = vector.load %arg8[%c0_13, %c8] : memref<64x36xbf16, #tpu.memory_space<vmem>>, vector<64x4xbf16>
    tpu.vector_store %arg8[%c0_13, %c8], %10 {strides = array<i32>} : memref<64x36xbf16, #tpu.memory_space<vmem>>, vector<64x4xbf16>,
    %c2 = arith.constant 2 : index
    %c0_14 = arith.constant 0 : index
    %c0_15 = arith.constant 0 : index
    %c0_16 = arith.constant 0 : index
    %12 = vector.load %arg1[%c2, %c0_14, %c0_15, %c0_16] : memref<4x9x9x4xbf16, #tpu.memory_space<vmem>>, vector<1x8x8x4xbf16>
    %13 = vector.shape_cast %12 : vector<1x8x8x4xbf16> to vector<8x8x4xbf16>
    %14 = vector.shape_cast %13 : vector<8x8x4xbf16> to vector<64x4xbf16>
    %c0_17 = arith.constant 0 : index
    %c12 = arith.constant 12 : index
    %15 = vector.load %arg8[%c0_17, %c12] : memref<64x36xbf16, #tpu.memory_space<vmem>>, vector<64x4xbf16>
    tpu.vector_store %arg8[%c0_17, %c12], %14 {strides = array<i32>} : memref<64x36xbf16, #tpu.memory_space<vmem>>, vector<64x4xbf16>,
    %c3 = arith.constant 3 : index
    %c0_18 = arith.constant 0 : index
    %c0_19 = arith.constant 0 : index
    %c0_20 = arith.constant 0 : index
    %16 = vector.load %arg1[%c3, %c0_18, %c0_19, %c0_20] : memref<4x9x9x4xbf16, #tpu.memory_space<vmem>>, vector<1x8x8x4xbf16>
    %17 = vector.shape_cast %16 : vector<1x8x8x4xbf16> to vector<8x8x4xbf16>
    %18 = vector.shape_cast %17 : vector<8x8x4xbf16> to vector<64x4xbf16>
    %c0_21 = arith.constant 0 : index
    %c16 = arith.constant 16 : index
    %19 = vector.load %arg8[%c0_21, %c16] : memref<64x36xbf16, #tpu.memory_space<vmem>>, vector<64x4xbf16>
    tpu.vector_store %arg8[%c0_21, %c16], %18 {strides = array<i32>} : memref<64x36xbf16, #tpu.memory_space<vmem>>, vector<64x4xbf16>,
    %c2_22 = arith.constant 2 : index
    %c0_23 = arith.constant 0 : index
    %c1_24 = arith.constant 1 : index
    %c0_25 = arith.constant 0 : index
    %20 = vector.load %arg1[%c2_22, %c0_23, %c1_24, %c0_25] : memref<4x9x9x4xbf16, #tpu.memory_space<vmem>>, vector<1x8x8x4xbf16>
    %21 = vector.shape_cast %20 : vector<1x8x8x4xbf16> to vector<8x8x4xbf16>
    %22 = vector.shape_cast %21 : vector<8x8x4xbf16> to vector<64x4xbf16>
    %c0_26 = arith.constant 0 : index
    %c20 = arith.constant 20 : index
    %23 = vector.load %arg8[%c0_26, %c20] : memref<64x36xbf16, #tpu.memory_space<vmem>>, vector<64x4xbf16>
    tpu.vector_store %arg8[%c0_26, %c20], %22 {strides = array<i32>} : memref<64x36xbf16, #tpu.memory_space<vmem>>, vector<64x4xbf16>,
    %c0_27 = arith.constant 0 : index
    %c1_28 = arith.constant 1 : index
    %c0_29 = arith.constant 0 : index
    %c0_30 = arith.constant 0 : index
    %24 = vector.load %arg1[%c0_27, %c1_28, %c0_29, %c0_30] : memref<4x9x9x4xbf16, #tpu.memory_space<vmem>>, vector<1x8x8x4xbf16>
    %25 = vector.shape_cast %24 : vector<1x8x8x4xbf16> to vector<8x8x4xbf16>
    %26 = vector.shape_cast %25 : vector<8x8x4xbf16> to vector<64x4xbf16>
    %c0_31 = arith.constant 0 : index
    %c24 = arith.constant 24 : index
    %27 = vector.load %arg8[%c0_31, %c24] : memref<64x36xbf16, #tpu.memory_space<vmem>>, vector<64x4xbf16>
    tpu.vector_store %arg8[%c0_31, %c24], %26 {strides = array<i32>} : memref<64x36xbf16, #tpu.memory_space<vmem>>, vector<64x4xbf16>,
    %c1_32 = arith.constant 1 : index
    %c1_33 = arith.constant 1 : index
    %c0_34 = arith.constant 0 : index
    %c0_35 = arith.constant 0 : index
    %28 = vector.load %arg1[%c1_32, %c1_33, %c0_34, %c0_35] : memref<4x9x9x4xbf16, #tpu.memory_space<vmem>>, vector<1x8x8x4xbf16>
    %29 = vector.shape_cast %28 : vector<1x8x8x4xbf16> to vector<8x8x4xbf16>
    %30 = vector.shape_cast %29 : vector<8x8x4xbf16> to vector<64x4xbf16>
    %c0_36 = arith.constant 0 : index
    %c28 = arith.constant 28 : index
    %31 = vector.load %arg8[%c0_36, %c28] : memref<64x36xbf16, #tpu.memory_space<vmem>>, vector<64x4xbf16>
    tpu.vector_store %arg8[%c0_36, %c28], %30 {strides = array<i32>} : memref<64x36xbf16, #tpu.memory_space<vmem>>, vector<64x4xbf16>,
    %c0_37 = arith.constant 0 : index
    %c1_38 = arith.constant 1 : index
    %c1_39 = arith.constant 1 : index
    %c0_40 = arith.constant 0 : index
    %32 = vector.load %arg1[%c0_37, %c1_38, %c1_39, %c0_40] : memref<4x9x9x4xbf16, #tpu.memory_space<vmem>>, vector<1x8x8x4xbf16>
    %33 = vector.shape_cast %32 : vector<1x8x8x4xbf16> to vector<8x8x4xbf16>
    %34 = vector.shape_cast %33 : vector<8x8x4xbf16> to vector<64x4xbf16>
    %c0_41 = arith.constant 0 : index
    %c32 = arith.constant 32 : index
    %35 = vector.load %arg8[%c0_41, %c32] : memref<64x36xbf16, #tpu.memory_space<vmem>>, vector<64x4xbf16>
    tpu.vector_store %arg8[%c0_41, %c32], %34 {strides = array<i32>} : memref<64x36xbf16, #tpu.memory_space<vmem>>, vector<64x4xbf16>,
    %c0_42 = arith.constant 0 : index
    %c0_43 = arith.constant 0 : index
    %36 = vector.load %arg8[%c0_42, %c0_43] : memref<64x36xbf16, #tpu.memory_space<vmem>>, vector<64x36xbf16>
    %c0_44 = arith.constant 0 : index
    %c0_45 = arith.constant 0 : index
    %37 = vector.load %arg2[%c0_44, %c0_45] : memref<36x16xbf16, #tpu.memory_space<vmem>>, vector<36x16xbf16>
    %cst = arith.constant dense<0.000000e+00> : vector<64x16xf32>
    %38 = tpu.matmul %36, %37, %cst {dimension_numbers = #tpu.dot_dimension_numbers<[1], [0], [0], [1], [0, 0, 1, 1], [], []>} : vector<64x36xbf16>, vector<36x16xbf16>, vector<64x16xf32> -> vector<64x16xf32>
    %c0_46 = arith.constant 0 : index
    %c0_47 = arith.constant 0 : index
    %39 = vector.load %arg3[%c0_46, %c0_47] : memref<1x16xf32, #tpu.memory_space<vmem>>, vector<1x16xf32>
    %40 = vector.broadcast %39 : vector<1x16xf32> to vector<64x16xf32>
    %41 = arith.addf %38, %40 : vector<64x16xf32>
    %42 = vector.extract_strided_slice %41 {offsets = [0, 0], sizes = [64, 8], strides = [1, 1]} : vector<64x16xf32> to vector<64x8xf32>
    %cst_48 = arith.constant 0.000000e+00 : f32
    %43 = vector.broadcast %cst_48 : f32 to vector<64x8xf32>
    %44 = arith.maximumf %42, %43 : vector<64x8xf32>
    %45 = vector.extract_strided_slice %41 {offsets = [0, 8], sizes = [64, 8], strides = [1, 1]} : vector<64x16xf32> to vector<64x8xf32>
    %46 = vector.shape_cast %44 : vector<64x8xf32> to vector<8x8x8xf32>
    %47 = arith.truncf %46 : vector<8x8x8xf32> to vector<8x8x8xbf16>
    %c1_49 = arith.constant 1 : index
    %c8_50 = arith.constant 8 : index
    %c0_51 = arith.constant 0 : index
    %48 = vector.load %arg7[%c1_49, %c8_50, %c0_51] : memref<10x17x8xbf16, #tpu.memory_space<vmem>>, vector<8x8x8xbf16>
    tpu.vector_store %arg7[%c1_49, %c8_50, %c0_51], %47 {strides = array<i32>} : memref<10x17x8xbf16, #tpu.memory_space<vmem>>, vector<8x8x8xbf16>,
    %cst_52 = arith.constant 0.000000e+00 : bf16
    %49 = vector.broadcast %cst_52 : bf16 to vector<1x10x8xbf16>
    %c0_53 = arith.constant 0 : index
    %c7 = arith.constant 7 : index
    %c0_54 = arith.constant 0 : index
    %50 = vector.load %arg7[%c0_53, %c7, %c0_54] : memref<10x17x8xbf16, #tpu.memory_space<vmem>>, vector<1x10x8xbf16>
    tpu.vector_store %arg7[%c0_53, %c7, %c0_54], %49 {strides = array<i32>} : memref<10x17x8xbf16, #tpu.memory_space<vmem>>, vector<1x10x8xbf16>,
    %c9 = arith.constant 9 : index
    %c7_55 = arith.constant 7 : index
    %c0_56 = arith.constant 0 : index
    %51 = vector.load %arg7[%c9, %c7_55, %c0_56] : memref<10x17x8xbf16, #tpu.memory_space<vmem>>, vector<1x10x8xbf16>
    tpu.vector_store %arg7[%c9, %c7_55, %c0_56], %49 {strides = array<i32>} : memref<10x17x8xbf16, #tpu.memory_space<vmem>>, vector<1x10x8xbf16>,
    %cst_57 = arith.constant 0.000000e+00 : bf16
    %52 = vector.broadcast %cst_57 : bf16 to vector<8x1x8xbf16>
    %c1_58 = arith.constant 1 : index
    %c7_59 = arith.constant 7 : index
    %c0_60 = arith.constant 0 : index
    %53 = vector.load %arg7[%c1_58, %c7_59, %c0_60] : memref<10x17x8xbf16, #tpu.memory_space<vmem>>, vector<8x1x8xbf16>
    tpu.vector_store %arg7[%c1_58, %c7_59, %c0_60], %52 {strides = array<i32>} : memref<10x17x8xbf16, #tpu.memory_space<vmem>>, vector<8x1x8xbf16>,
    %c1_61 = arith.constant 1 : index
    %c16_62 = arith.constant 16 : index
    %c0_63 = arith.constant 0 : index
    %54 = vector.load %arg7[%c1_61, %c16_62, %c0_63] : memref<10x17x8xbf16, #tpu.memory_space<vmem>>, vector<8x1x8xbf16>
    tpu.vector_store %arg7[%c1_61, %c16_62, %c0_63], %52 {strides = array<i32>} : memref<10x17x8xbf16, #tpu.memory_space<vmem>>, vector<8x1x8xbf16>,
    %c0_64 = arith.constant 0 : index
    %c7_65 = arith.constant 7 : index
    %c0_66 = arith.constant 0 : index
    %55 = vector.load %arg7[%c0_64, %c7_65, %c0_66] : memref<10x17x8xbf16, #tpu.memory_space<vmem>>, vector<8x8x8xbf16>
    %56 = vector.shape_cast %55 : vector<8x8x8xbf16> to vector<64x8xbf16>
    %c0_67 = arith.constant 0 : index
    %c0_68 = arith.constant 0 : index
    %57 = vector.load %arg9[%c0_67, %c0_68] : memref<64x72xbf16, #tpu.memory_space<vmem>>, vector<64x8xbf16>
    tpu.vector_store %arg9[%c0_67, %c0_68], %56 {strides = array<i32>} : memref<64x72xbf16, #tpu.memory_space<vmem>>, vector<64x8xbf16>,
    %c0_69 = arith.constant 0 : index
    %c8_70 = arith.constant 8 : index
    %c0_71 = arith.constant 0 : index
    %58 = vector.load %arg7[%c0_69, %c8_70, %c0_71] : memref<10x17x8xbf16, #tpu.memory_space<vmem>>, vector<8x8x8xbf16>
    %59 = vector.shape_cast %58 : vector<8x8x8xbf16> to vector<64x8xbf16>
    %c0_72 = arith.constant 0 : index
    %c8_73 = arith.constant 8 : index
    %60 = vector.load %arg9[%c0_72, %c8_73] : memref<64x72xbf16, #tpu.memory_space<vmem>>, vector<64x8xbf16>
    tpu.vector_store %arg9[%c0_72, %c8_73], %59 {strides = array<i32>} : memref<64x72xbf16, #tpu.memory_space<vmem>>, vector<64x8xbf16>,
    %c0_74 = arith.constant 0 : index
    %c9_75 = arith.constant 9 : index
    %c0_76 = arith.constant 0 : index
    %61 = vector.load %arg7[%c0_74, %c9_75, %c0_76] : memref<10x17x8xbf16, #tpu.memory_space<vmem>>, vector<8x8x8xbf16>
    %62 = vector.shape_cast %61 : vector<8x8x8xbf16> to vector<64x8xbf16>
    %c0_77 = arith.constant 0 : index
    %c16_78 = arith.constant 16 : index
    %63 = vector.load %arg9[%c0_77, %c16_78] : memref<64x72xbf16, #tpu.memory_space<vmem>>, vector<64x8xbf16>
    tpu.vector_store %arg9[%c0_77, %c16_78], %62 {strides = array<i32>} : memref<64x72xbf16, #tpu.memory_space<vmem>>, vector<64x8xbf16>,
    %c1_79 = arith.constant 1 : index
    %c7_80 = arith.constant 7 : index
    %c0_81 = arith.constant 0 : index
    %64 = vector.load %arg7[%c1_79, %c7_80, %c0_81] : memref<10x17x8xbf16, #tpu.memory_space<vmem>>, vector<8x8x8xbf16>
    %65 = vector.shape_cast %64 : vector<8x8x8xbf16> to vector<64x8xbf16>
    %c0_82 = arith.constant 0 : index
    %c24_83 = arith.constant 24 : index
    %66 = vector.load %arg9[%c0_82, %c24_83] : memref<64x72xbf16, #tpu.memory_space<vmem>>, vector<64x8xbf16>
    tpu.vector_store %arg9[%c0_82, %c24_83], %65 {strides = array<i32>} : memref<64x72xbf16, #tpu.memory_space<vmem>>, vector<64x8xbf16>,
    %c1_84 = arith.constant 1 : index
    %c8_85 = arith.constant 8 : index
    %c0_86 = arith.constant 0 : index
    %67 = vector.load %arg7[%c1_84, %c8_85, %c0_86] : memref<10x17x8xbf16, #tpu.memory_space<vmem>>, vector<8x8x8xbf16>
    %68 = vector.shape_cast %67 : vector<8x8x8xbf16> to vector<64x8xbf16>
    %c0_87 = arith.constant 0 : index
    %c32_88 = arith.constant 32 : index
    %69 = vector.load %arg9[%c0_87, %c32_88] : memref<64x72xbf16, #tpu.memory_space<vmem>>, vector<64x8xbf16>
    tpu.vector_store %arg9[%c0_87, %c32_88], %68 {strides = array<i32>} : memref<64x72xbf16, #tpu.memory_space<vmem>>, vector<64x8xbf16>,
    %c1_89 = arith.constant 1 : index
    %c9_90 = arith.constant 9 : index
    %c0_91 = arith.constant 0 : index
    %70 = vector.load %arg7[%c1_89, %c9_90, %c0_91] : memref<10x17x8xbf16, #tpu.memory_space<vmem>>, vector<8x8x8xbf16>
    %71 = vector.shape_cast %70 : vector<8x8x8xbf16> to vector<64x8xbf16>
    %c0_92 = arith.constant 0 : index
    %c40 = arith.constant 40 : index
    %72 = vector.load %arg9[%c0_92, %c40] : memref<64x72xbf16, #tpu.memory_space<vmem>>, vector<64x8xbf16>
    tpu.vector_store %arg9[%c0_92, %c40], %71 {strides = array<i32>} : memref<64x72xbf16, #tpu.memory_space<vmem>>, vector<64x8xbf16>,
    %c2_93 = arith.constant 2 : index
    %c7_94 = arith.constant 7 : index
    %c0_95 = arith.constant 0 : index
    %73 = vector.load %arg7[%c2_93, %c7_94, %c0_95] : memref<10x17x8xbf16, #tpu.memory_space<vmem>>, vector<8x8x8xbf16>
    %74 = vector.shape_cast %73 : vector<8x8x8xbf16> to vector<64x8xbf16>
    %c0_96 = arith.constant 0 : index
    %c48 = arith.constant 48 : index
    %75 = vector.load %arg9[%c0_96, %c48] : memref<64x72xbf16, #tpu.memory_space<vmem>>, vector<64x8xbf16>
    tpu.vector_store %arg9[%c0_96, %c48], %74 {strides = array<i32>} : memref<64x72xbf16, #tpu.memory_space<vmem>>, vector<64x8xbf16>,
    %c2_97 = arith.constant 2 : index
    %c8_98 = arith.constant 8 : index
    %c0_99 = arith.constant 0 : index
    %76 = vector.load %arg7[%c2_97, %c8_98, %c0_99] : memref<10x17x8xbf16, #tpu.memory_space<vmem>>, vector<8x8x8xbf16>
    %77 = vector.shape_cast %76 : vector<8x8x8xbf16> to vector<64x8xbf16>
    %c0_100 = arith.constant 0 : index
    %c56 = arith.constant 56 : index
    %78 = vector.load %arg9[%c0_100, %c56] : memref<64x72xbf16, #tpu.memory_space<vmem>>, vector<64x8xbf16>
    tpu.vector_store %arg9[%c0_100, %c56], %77 {strides = array<i32>} : memref<64x72xbf16, #tpu.memory_space<vmem>>, vector<64x8xbf16>,
    %c2_101 = arith.constant 2 : index
    %c9_102 = arith.constant 9 : index
    %c0_103 = arith.constant 0 : index
    %79 = vector.load %arg7[%c2_101, %c9_102, %c0_103] : memref<10x17x8xbf16, #tpu.memory_space<vmem>>, vector<8x8x8xbf16>
    %80 = vector.shape_cast %79 : vector<8x8x8xbf16> to vector<64x8xbf16>
    %c0_104 = arith.constant 0 : index
    %c64 = arith.constant 64 : index
    %81 = vector.load %arg9[%c0_104, %c64] : memref<64x72xbf16, #tpu.memory_space<vmem>>, vector<64x8xbf16>
    tpu.vector_store %arg9[%c0_104, %c64], %80 {strides = array<i32>} : memref<64x72xbf16, #tpu.memory_space<vmem>>, vector<64x8xbf16>,
    %c0_105 = arith.constant 0 : index
    %c0_106 = arith.constant 0 : index
    %82 = vector.load %arg9[%c0_105, %c0_106] : memref<64x72xbf16, #tpu.memory_space<vmem>>, vector<64x72xbf16>
    %c0_107 = arith.constant 0 : index
    %c0_108 = arith.constant 0 : index
    %83 = vector.load %arg4[%c0_107, %c0_108] : memref<72x8xbf16, #tpu.memory_space<vmem>>, vector<72x8xbf16>
    %cst_109 = arith.constant dense<0.000000e+00> : vector<64x8xf32>
    %84 = tpu.matmul %82, %83, %cst_109 {dimension_numbers = #tpu.dot_dimension_numbers<[1], [0], [0], [1], [0, 0, 1, 1], [], []>} : vector<64x72xbf16>, vector<72x8xbf16>, vector<64x8xf32> -> vector<64x8xf32>
    %c0_110 = arith.constant 0 : index
    %c0_111 = arith.constant 0 : index
    %85 = vector.load %arg5[%c0_110, %c0_111] : memref<1x8xf32, #tpu.memory_space<vmem>>, vector<1x8xf32>
    %86 = vector.broadcast %85 : vector<1x8xf32> to vector<64x8xf32>
    %87 = arith.addf %84, %86 : vector<64x8xf32>
    %88 = arith.addf %87, %45 : vector<64x8xf32>
    %cst_112 = arith.constant 0.000000e+00 : f32
    %89 = vector.broadcast %cst_112 : f32 to vector<64x8xf32>
    %90 = arith.maximumf %88, %89 : vector<64x8xf32>
    %91 = arith.truncf %90 : vector<64x8xf32> to vector<64x8xbf16>
    %c0_113 = arith.constant 0 : index
    %c0_114 = arith.constant 0 : index
    %c0_115 = arith.constant 0 : index
    %92 = vector.load %arg6[%c0_113, %c0_114, %c0_115] : memref<1x64x8xbf16, #tpu.memory_space<vmem>>, vector<1x64x8xbf16>
    %93 = vector.shape_cast %92 : vector<1x64x8xbf16> to vector<64x8xbf16>
    %94 = vector.shape_cast %91 : vector<64x8xbf16> to vector<1x64x8xbf16>
    tpu.vector_store %arg6[%c0_113, %c0_114, %c0_115], %94 {strides = array<i32>} : memref<1x64x8xbf16, #tpu.memory_space<vmem>>, vector<1x64x8xbf16>,
    return
  }
  func.func @transform_0(%arg0: i32) -> (i32, i32, i32, i32) {
    %c0_i32 = arith.constant 0 : i32
    %c0_i32_0 = arith.constant 0 : i32
    %c0_i32_1 = arith.constant 0 : i32
    %c0_i32_2 = arith.constant 0 : i32
    return %arg0, %c0_i32, %c0_i32_0, %c0_i32_1 : i32, i32, i32, i32
  }
  func.func @transform_1(%arg0: i32) -> (i32, i32) {
    %c0_i32 = arith.constant 0 : i32
    %c0_i32_0 = arith.constant 0 : i32
    %c0_i32_1 = arith.constant 0 : i32
    return %c0_i32, %c0_i32_0 : i32, i32
  }
  func.func @transform_2(%arg0: i32) -> (i32, i32) {
    %c0_i32 = arith.constant 0 : i32
    %c0_i32_0 = arith.constant 0 : i32
    %c0_i32_1 = arith.constant 0 : i32
    return %c0_i32, %c0_i32_0 : i32, i32
  }
  func.func @transform_3(%arg0: i32) -> (i32, i32) {
    %c0_i32 = arith.constant 0 : i32
    %c0_i32_0 = arith.constant 0 : i32
    %c0_i32_1 = arith.constant 0 : i32
    return %c0_i32, %c0_i32_0 : i32, i32
  }
  func.func @transform_4(%arg0: i32) -> (i32, i32) {
    %c0_i32 = arith.constant 0 : i32
    %c0_i32_0 = arith.constant 0 : i32
    %c0_i32_1 = arith.constant 0 : i32
    return %c0_i32, %c0_i32_0 : i32, i32
  }
  func.func @transform_5(%arg0: i32) -> (i32, i32, i32) {
    %c0_i32 = arith.constant 0 : i32
    %c0_i32_0 = arith.constant 0 : i32
    %c0_i32_1 = arith.constant 0 : i32
    return %arg0, %c0_i32, %c0_i32_0 : i32, i32, i32
  }
}

</mosaic_0001>

<bundles_post_ra>
// kernel: tpu_custom_call.1
= control target key start
LH: loop header
LB: loop body
LE: loop exit
PB: predicated region body
PF: predicated region fallthrough
CT: control target
= control target key end

     0   :  { %s2883_s18 = smov 0   ;;  %s3653_s0 = inlined_call_operand.vmem [shape: bf16[8,9,9,4], index: 0, kind: input, shape index: {}]   ;;  %s3654_s1 = inlined_call_operand.vmem [shape: bf16[36,16], index: 1, kind: input, shape index: {}]   ;;  %s3655_s2 = inlined_call_operand.vmem [shape: f32[1,16], index: 2, kind: input, shape index: {}]   ;;  %s3656_s3 = inlined_call_operand.vmem [shape: bf16[72,8], index: 3, kind: input, shape index: {}]   ;;  %s3657_s4 = inlined_call_operand.vmem [shape: f32[1,8], index: 4, kind: input, shape index: {}]   ;;  %s3658_s5 = inlined_call_operand.vmem [shape: bf16[2,64,8], index: 5, kind: output, shape index: {}]  }
   0x1 LB: > { %s2889_s19 = sadd.s32 4294967295, %s2837_s18   ;;  %p2504_p0 = scmp.ge.s32.totalorder %s2837_s18, 1  ;;  %s2837_s18 = sphi %s2883_s18, %s15_s18  }
   0x2   : > { %p189_p1 = scmp.lt.s32.totalorder %s2837_s18, 3 }
   0x4   : > { %p190_p2 = pnand %p2504_p0, %p189_p1 }
   0x6   : > { %193 = sbr.rel (%p190_p2) target bundleno = 840 (0x348), region = 40 }
   0xd   : > { %s2505_s20 = sshll.u32 %s2889_s19, 2  ;;  %vm330_vm0 = vsmask.f32 3328  ;;  %vm331_vm1 = vsmask.f32 7440  ;;  %s2839_s25 = smov 12  }
   0xe   : > { %p219_p3 = scmp.lt.s32.totalorder %s2505_s20, 7  ;;  %s2840_s26 = smov 4   ;;  %vm2922_vm2 = vmor %vm330_vm0, %vm331_vm1  ;;  %vm263_vm3 = vcmask 31744   ;;  %vm1016_vm4 = vcmask 1041408   ;;  %vm309_vm5 = vcmask 64544   ;;  %vm469_vm6 = vcmask 97344  }
   0xf   : > { %s2841_s27 = smov 16   ;;  %s2842_s28 = smov 24   ;;  %vm515_vm7 = vcmask 130144   ;;  %vm561_vm8 = vcmask 162944   ;;  %vm718_vm9 = vcmask 195744   ;;  %vm764_vm10 = vcmask 228544  }
  0x10   : > { %s3717_s20 = smov (!%p219_p3, %s2505_s20), 7  ;;  %s2843_s29 = smov 8   ;;  %vm810_vm11 = vcmask 261344   ;;  %vm967_vm12 = vcmask 294144   ;;  %vm1003_vm13 = vcmask 293888   ;;  %vm1102_vm14 = vcmask 60416  }
  0x11   : > { %s2764_s21 = smul.u32 72, %s3717_s20  ;;  %s2844_s30 = smov 20   ;;  %vm1111_vm15 = vcmask 60419   ;;  %vm1112_vm0 = vsmask.f32 7950 }
  0x12   : > { %s2845_s8 = smov 28   ;;  %s2846_s11 = smov 32   ;;  %vm3108_vm1 = vmand %vm1111_vm15, %vm1112_vm0  ;;  %v2830_v30 = vld [vmem:[%s3656_s3 + $0x20] ss:$0 sps:$4 sm:$0xff]   ;;  %vm2021_vm15 = vcmask 458112   ;;  %vm2066_vm0 = vcmask 523712  }
  0x13   : > { %s2897_s24 = scalar_lea.vmem %s3653_s0, %s2764_s21  ;;  %s2848_s16 = smov 56  }
  0x14   : > { %v2787_v0 = vld [vmem:[%s2897_s24 + $0xa0] ss:$8 sps:$4 sm:$0xff]   ;;  %v2792_v5 = vld [vmem:[%s2897_s24 + $0x90] ss:$8 sps:$4 sm:$0xff]   ;;  %v315_v7 = vld [vmem:[%s2897_s24 + $0x4] sm:$0x1] }
  0x15   : > { %v2788_v1 = vld [vmem:[%s2897_s24 + $0x48] ss:$8 sps:$4 sm:$0xff]   ;;  %505 = vrot.lane.b32.xlu1 %v2787_v0, %s2839_s25  ;;  %v2790_v3 = vld [vmem:[%s2897_s24 + $0x58] ss:$8 sps:$4 sm:$0xff]   ;;  %v317_v9 = vld [vmem:[%s2897_s24 + $0xc] sm:$0x1] }
  0x16   : > { %v2789_v2 = vld [vmem:[%s2897_s24 + $0xe8] ss:$8 sps:$4 sm:$0xff]   ;;  %297 = vrot.lane.b32.xlu0 %v2788_v1, %s2840_s26  ;;  %v2791_v4 = vld [vmem:[%s2897_s24 + $0x18] ss:$8 sps:$4 sm:$0xff]   ;;  %v343_v12 = vshll.u32 %v315_v7, 16  ;;  %v357_v15 = vshll.u32 %v317_v9, 16 }
  0x17   : > { %v314_v6 = vld [vmem:[%s2897_s24] sm:$0xf]  ;;  %v316_v8 = vld [vmem:[%s2897_s24 + $0x8] sm:$0xf]  ;;  %v318_v23 = vld [vmem:[%s2897_s24 + $0x10] sm:$0xf] }
  0x18   : > { %v334_v10 = vshrl.u32 %v314_v6, 16  ;;  %v337_v11 = vshll.u32 %v314_v6, 16  ;;  %v348_v13 = vshrl.u32 %v316_v8, 16  ;;  %v351_v14 = vshll.u32 %v316_v8, 16  ;;  %v2793_v20 = vld [vmem:[%s2897_s24 + $0xd8] ss:$8 sps:$4 sm:$0xff]  }
  0x19   : > { %551 = vrot.lane.b32.xlu1 %v2789_v2, %s2841_s27  ;;  %v345_v18 = vrot.slane %v343_v12, 5  ;;  %v359_v22 = vrot.slane %v357_v15, 5  ;;  %v319_v24 = vld [vmem:[%s2897_s24 + $0x14] sm:$0x1]  ;;  %v320_v26 = vld [vmem:[%s2897_s24 + $0x18] sm:$0xf] }
  0x1a   : > { %299 = vrot.lane.b32.xlu0 %v2790_v3, %s2840_s26  ;;  %v336_v16 = vrot.slane %v334_v10, 4  ;;  %v339_v17 = vrot.slane %v337_v11, 5  ;;  %v350_v19 = vrot.slane %v348_v13, 4  ;;  %v353_v21 = vrot.slane %v351_v14, 5  ;;  %v321_v27 = vld [vmem:[%s2897_s24 + $0x1c] sm:$0x1] }
  0x1b   : > { %v362_v28 = vshrl.u32 %v318_v23, 16  ;;  %v365_v29 = vshll.u32 %v318_v23, 16  ;;  %v371_v32 = vshll.u32 %v319_v24, 16  ;;  %v376_v33 = vshrl.u32 %v320_v26, 16  ;;  %v2794_v42 = vld [vmem:[%s2897_s24 + $0x8] ss:$8 sps:$4 sm:$0xff]  }
  0x1c   : > { %v340_v25 = vor.u32 %v339_v17, %v336_v16  ;;  %v354_v31 = vor.u32 %v353_v21, %v350_v19  ;;  %v379_v34 = vshll.u32 %v320_v26, 16  ;;  %v385_v38 = vshll.u32 %v321_v27, 16  ;;  %v2557_v47 = vld [vmem:[%s2897_s24 + $0xa0] sm:$0xf]  ;;  %v2558_v48 = vld [vmem:[%s2897_s24 + $0xa4] sm:$0x1] }
  0x1d   : > { %754 = vrot.lane.b32.xlu1 %v2791_v4, %s2842_s28  ;;  %v364_v36 = vrot.slane %v362_v28, 4  ;;  %v367_v37 = vrot.slane %v365_v29, 5  ;;  %v378_v40 = vrot.slane %v376_v33, 4  ;;  %v373_v45 = vrot.slane %v371_v32, 5  ;;  %v2559_v51 = vld [vmem:[%s2897_s24 + $0xa8] sm:$0xf] }
  0x1e   : > { %503 = vrot.lane.b32.xlu0 %v2792_v5, %s2839_s25  ;;  %v341_v35 = vrot.slane %v340_v25, 4  ;;  %v355_v39 = vrot.slane %v354_v31, 4  ;;  %v381_v41 = vrot.slane %v379_v34, 5  ;;  %v387_v46 = vrot.slane %v385_v38, 5  ;;  %v2560_v52 = vld [vmem:[%s2897_s24 + $0xac] sm:$0x1] }
  0x1f   : > { %v368_v44 = vor.u32 %v367_v37, %v364_v36  ;;  %v611_v53 = vshrl.u32 %v2557_v47, 16  ;;  %v614_v54 = vshll.u32 %v2557_v47, 16  ;;  %v620_v57 = vshll.u32 %v2558_v48, 16  ;;  %v2553_v59 = vld [vmem:[%s2897_s24 + $0x90] sm:$0xf]  ;;  %s2849_s17 = smov 48  }
  0x20   : > { %v346_v43 = vsel %vm2922_vm2, %v341_v35, %v345_v18  ;;  %v360_v49 = vsel %vm2922_vm2, %v355_v39, %v359_v22  ;;  %v382_v50 = vor.u32 %v381_v41, %v378_v40  ;;  %v625_v58 = vshrl.u32 %v2559_v51, 16  ;;  %v2554_v0 = vld [vmem:[%s2897_s24 + $0x94] sm:$0x1]  ;;  %v2555_v5 = vld [vmem:[%s2897_s24 + $0x98] sm:$0xf]  ;;  %p225_p4 = scmp.lt.s32.totalorder %s2889_s19, 1 }
  0x21   : > { %v2525_v55 = vcombine.low %v346_v43, %v360_v49  ;;  %v369_v56 = vrot.slane %v368_v44, 4  ;;  %v613_v61 = vrot.slane %v611_v53, 4  ;;  %v616_v62 = vrot.slane %v614_v54, 5  ;;  %v2556_v9 = vld [vmem:[%s2897_s24 + $0x9c] sm:$0x1] }
  0x22   : > { %549 = vrot.lane.b32.xlu0 %v2793_v20, %s2841_s27  ;;  %v383_v60 = vrot.slane %v382_v50, 4  ;;  %v628_v63 = vshll.u32 %v2559_v51, 16  ;;  %v622_v2 = vrot.slane %v620_v57, 5  ;;  %v627_v3 = vrot.slane %v625_v58, 4  ;;  %v2597_v29 = vld [vmem:[%s2897_s24 + $0x8] sm:$0xf] }
  0x23   : > { %457 = vrot.lane.b32.xlu1 %v2525_v55, %s2843_s29  ;;  %v374_v1 = vsel %vm2922_vm2, %v369_v56, %v373_v45  ;;  %v634_v4 = vshll.u32 %v2560_v52, 16  ;;  %v617_v7 = vor.u32 %v616_v62, %v613_v61  ;;  %v583_v10 = vshrl.u32 %v2553_v59, 16  ;;  %v2598_v31 = vld [vmem:[%s2897_s24 + $0xc] sm:$0x1]  ;;  %v2599_v33 = vld [vmem:[%s2897_s24 + $0x10] sm:$0xf] }
  0x24   : > { %v388_v6 = vsel %vm2922_vm2, %v383_v60, %v387_v46  ;;  %v630_v8 = vrot.slane %v628_v63, 5  ;;  %v586_v13 = vshll.u32 %v2553_v59, 16  ;;  %v592_v14 = vshll.u32 %v2554_v0, 16  ;;  %v2600_v34 = vld [vmem:[%s2897_s24 + $0x14] sm:$0x1]  ;;  %v2809_v51 = vld [vmem:[%s3654_s1] sm:$0xff]  }
  0x25   : > { %v2526_v11 = vcombine.low %v374_v1, %v388_v6  ;;  %v636_v12 = vrot.slane %v634_v4, 5  ;;  %v618_v15 = vrot.slane %v617_v7, 4  ;;  %v585_v17 = vrot.slane %v583_v10, 4  ;;  %v2796_v41 = vld [vmem:[%s2897_s24 + $0x60] ss:$8 sps:$4 sm:$0xff]   ;;  %2730 = vmatprep.subr.bf16.mxu0 %v2809_v51  ;;  %s3719_s19 = smov (!%p225_p4, %s2889_s19), 1 }
  0x26   : > { %752 = vrot.lane.b32.xlu0 %v2794_v42, %s2842_s28  ;;  %v631_v16 = vor.u32 %v630_v8, %v627_v3  ;;  %v597_v18 = vshrl.u32 %v2555_v5, 16  ;;  %v588_v19 = vrot.slane %v586_v13, 5  ;;  %v600_v20 = vshll.u32 %v2555_v5, 16  ;;  %v2601_v50 = vld [vmem:[%s2897_s24 + $0x18] sm:$0xf]  ;;  %2731 = vmatpush3.bf16.msra.mxu0 %v2809_v51  ;;  %v2811_v13 = vld [vmem:[%s3654_s1 + $0x8] sm:$0xff]  }
  0x27   : > { %459 = vrot.lane.b32.xlu1 %v2526_v11, %s2843_s29  ;;  %v606_v21 = vshll.u32 %v2556_v9, 16  ;;  %v623_v22 = vsel %vm2922_vm2, %v618_v15, %v622_v2  ;;  %v594_v24 = vrot.slane %v592_v14, 5  ;;  %v832_v35 = vshrl.u32 %v2597_v29, 16  ;;  %v2602_v55 = vld [vmem:[%s2897_s24 + $0x1c] sm:$0x1]  ;;  %2732 = vmatprep.subr.bf16.mxu0 %v2811_v13  ;;  %s2705_s10 = sshll.u32 %s3719_s19, 5 }
  0x28   : > { %v632_v23 = vrot.slane %v631_v16, 4  ;;  %v599_v25 = vrot.slane %v597_v18, 4  ;;  %v589_v26 = vor.u32 %v588_v19, %v585_v17  ;;  %v602_v27 = vrot.slane %v600_v20, 5  ;;  %v2603_v56 = vld [vmem:[%s2897_s24 + $0x20] sm:$0xf]  ;;  %s3632_s13 = scalar_lea.vmem %s3658_s5, %s2705_s10 }
  0x29   : > { %v608_v28 = vrot.slane %v606_v21, 5  ;;  %v835_v36 = vshll.u32 %v2597_v29, 16  ;;  %v841_v40 = vshll.u32 %v2598_v31, 16  ;;  %v834_v42 = vrot.slane %v832_v35, 4  ;;  %v2604_v59 = vld [vmem:[%s2897_s24 + $0x24] sm:$0x1] }
  0x2a   : > { %v637_v32 = vsel %vm2922_vm2, %v632_v23, %v636_v12  ;;  %v590_v38 = vrot.slane %v589_v26, 4  ;;  %v603_v39 = vor.u32 %v602_v27, %v599_v25  ;;  %v846_v44 = vshrl.u32 %v2599_v33, 16  ;;  %v2795_v63 = vld [vmem:[%s2897_s24 + $0x50] ss:$8 sps:$4 sm:$0xff]   ;;  %v322_v12 = vld [vmem:[%s2897_s24 + $0x20] sm:$0xf]  ;;  %2733 = vmatpush3.bf16.msra.mxu0 %v2811_v13 }
  0x2b   : > { %v2570_v37 = vcombine.low %v623_v22, %v637_v32  ;;  %v837_v43 = vrot.slane %v835_v36, 5  ;;  %v849_v45 = vshll.u32 %v2599_v33, 16  ;;  %v843_v48 = vrot.slane %v841_v40, 5  ;;  %v2797_v3 = vld [vmem:[%s2897_s24 + $0x68] ss:$8 sps:$4 sm:$0xff]  }
  0x2c   : > { %v595_v46 = vsel %vm2922_vm2, %v590_v38, %v594_v24  ;;  %v604_v47 = vrot.slane %v603_v39, 4  ;;  %v855_v49 = vshll.u32 %v2600_v34, 16  ;;  %v848_v53 = vrot.slane %v846_v44, 4  ;;  %v2798_v17 = vld [vmem:[%s2897_s24 + $0x78] ss:$8 sps:$4 sm:$0xff]  }
  0x2d   : > { %708 = vrot.lane.b32.xlu1 %v2570_v37, %s2844_s30  ;;  %v838_v52 = vor.u32 %v837_v43, %v834_v42  ;;  %v851_v54 = vrot.slane %v849_v45, 5  ;;  %v860_v60 = vshrl.u32 %v2601_v50, 16  ;;  %v863_v61 = vshll.u32 %v2601_v50, 16  ;;  %v323_v18 = vld [vmem:[%s2897_s24 + $0x24] sm:$0x1] }
  0x2e   : > { %v609_v57 = vsel %vm2922_vm2, %v604_v47, %v608_v28  ;;  %v857_v58 = vrot.slane %v855_v49, 5  ;;  %v869_v2 = vshll.u32 %v2602_v55, 16  ;;  %v874_v6 = vshrl.u32 %v2603_v56, 16  ;;  %v324_v19 = vld [vmem:[%s2897_s24 + $0x28] sm:$0xf] }
  0x2f   : > { %v2569_v62 = vcombine.low %v595_v46, %v609_v57  ;;  %v839_v0 = vrot.slane %v838_v52, 4  ;;  %v852_v1 = vor.u32 %v851_v54, %v848_v53  ;;  %v862_v4 = vrot.slane %v860_v60, 4  ;;  %v325_v22 = vld [vmem:[%s2897_s24 + $0x2c] sm:$0x1]  ;;  %v326_v29 = vld [vmem:[%s2897_s24 + $0x30] sm:$0xf] }
  0x30   : > { %v865_v5 = vrot.slane %v863_v61, 5  ;;  %v877_v7 = vshll.u32 %v2603_v56, 16  ;;  %v871_v10 = vrot.slane %v869_v2, 5  ;;  %v883_v11 = vshll.u32 %v2604_v59, 16  ;;  %v327_v31 = vld [vmem:[%s2897_s24 + $0x34] sm:$0x1] }
  0x31   : > { %800 = vrot.lane.b32.xlu1 %v2796_v41, %s2845_s8  ;;  %706 = vrot.lane.b32.xlu0 %v2569_v62, %s2844_s30  ;;  %v844_v8 = vsel %vm2922_vm2, %v839_v0, %v843_v48  ;;  %v853_v9 = vrot.slane %v852_v1, 4  ;;  %v876_v15 = vrot.slane %v874_v6, 4  ;;  %v390_v23 = vshrl.u32 %v322_v12, 16  ;;  %v328_v36 = vld [vmem:[%s2897_s24 + $0x38] sm:$0xf] }
  0x32   : > { %v866_v14 = vor.u32 %v865_v5, %v862_v4  ;;  %v879_v16 = vrot.slane %v877_v7, 5  ;;  %v885_v21 = vrot.slane %v883_v11, 5  ;;  %v393_v24 = vshll.u32 %v322_v12, 16  ;;  %v329_v41 = vld [vmem:[%s2897_s24 + $0x3c] sm:$0x1] }
  0x33   : > { %v858_v20 = vsel %vm2922_vm2, %v853_v9, %v857_v58  ;;  %v399_v28 = vshll.u32 %v323_v18, 16  ;;  %v392_v32 = vrot.slane %v390_v23, 4  ;;  %v404_v34 = vshrl.u32 %v324_v19, 16  ;;  %v2561_v5 = vld [vmem:[%s2897_s24 + $0xb0] sm:$0xf] }
  0x34   : > { %v2613_v25 = vcombine.low %v844_v8, %v858_v20  ;;  %v867_v26 = vrot.slane %v866_v14, 4  ;;  %v880_v27 = vor.u32 %v879_v16, %v876_v15  ;;  %v395_v33 = vrot.slane %v393_v24, 5  ;;  %v2799_v6 = vld [vmem:[%s2897_s24 + $0xb0] ss:$8 sps:$4 sm:$0xff]   ;;  %v2562_v7 = vld [vmem:[%s2897_s24 + $0xb4] sm:$0x1] }
  0x35   : > { %301 = vrot.lane.b32.xlu1 %v2797_v3, %s2840_s26  ;;  %798 = vrot.lane.b32.xlu0 %v2795_v63, %s2845_s8  ;;  %v407_v35 = vshll.u32 %v324_v19, 16  ;;  %v401_v39 = vrot.slane %v399_v28, 5  ;;  %v413_v40 = vshll.u32 %v325_v22, 16  ;;  %v406_v43 = vrot.slane %v404_v34, 4  ;;  %v2563_v8 = vld [vmem:[%s2897_s24 + $0xb8] sm:$0xf] }
  0x36   : > { %v872_v37 = vsel %vm2922_vm2, %v867_v26, %v871_v10  ;;  %v881_v38 = vrot.slane %v880_v27, 4  ;;  %v396_v42 = vor.u32 %v395_v33, %v392_v32  ;;  %v418_v45 = vshrl.u32 %v326_v29, 16  ;;  %v2564_v9 = vld [vmem:[%s2897_s24 + $0xbc] sm:$0x1]  ;;  %v2565_v14 = vld [vmem:[%s2897_s24 + $0xc0] sm:$0xf] }
  0x37   : > { %v409_v44 = vrot.slane %v407_v35, 5  ;;  %v415_v47 = vrot.slane %v413_v40, 5  ;;  %v421_v48 = vshll.u32 %v326_v29, 16  ;;  %v427_v49 = vshll.u32 %v327_v31, 16  ;;  %v2566_v19 = vld [vmem:[%s2897_s24 + $0xc4] sm:$0x1] }
  0x38   : > { %v886_v46 = vsel %vm2922_vm2, %v881_v38, %v885_v21  ;;  %v397_v51 = vrot.slane %v396_v42, 4  ;;  %v420_v53 = vrot.slane %v418_v45, 4  ;;  %v432_v55 = vshrl.u32 %v328_v36, 16  ;;  %v2567_v23 = vld [vmem:[%s2897_s24 + $0xc8] sm:$0xf] }
  0x39   : > { %303 = vrot.lane.b32.xlu1 %v2798_v17, %s2840_s26  ;;  %955 = vrot.lane.b32.xlu0 %v2613_v25, %s2846_s11  ;;  %v2614_v50 = vcombine.low %v872_v37, %v886_v46  ;;  %v410_v52 = vor.u32 %v409_v44, %v406_v43  ;;  %v423_v54 = vrot.slane %v421_v48, 5  ;;  %v435_v56 = vshll.u32 %v328_v36, 16  ;;  %v2568_v24 = vld [vmem:[%s2897_s24 + $0xcc] sm:$0x1]  ;;  %v2800_v26 = vld [vmem:[%s2897_s24 + $0xc0] ss:$8 sps:$4 sm:$0xff]  }
  0x3a   : > { %v402_v57 = vsel %vm2922_vm2, %v397_v51, %v401_v39  ;;  %v441_v59 = vshll.u32 %v329_v41, 16  ;;  %v429_v61 = vrot.slane %v427_v49, 5  ;;  %v434_v62 = vrot.slane %v432_v55, 4  ;;  %v2801_v35 = vld [vmem:[%s2897_s24 + $0xf8] ss:$8 sps:$4 sm:$0xff]  }
  0x3b   : > { %v411_v58 = vrot.slane %v410_v52, 4  ;;  %v424_v60 = vor.u32 %v423_v54, %v420_v53  ;;  %v437_v63 = vrot.slane %v435_v56, 5  ;;  %v639_v12 = vshrl.u32 %v2561_v5, 16 }
  0x3c   : > { %v443_v4 = vrot.slane %v441_v59, 5  ;;  %v642_v13 = vshll.u32 %v2561_v5, 16  ;;  %v648_v15 = vshll.u32 %v2562_v7, 16  ;;  %v653_v16 = vshrl.u32 %v2563_v8, 16 }
  0x3d   : > { %957 = vrot.lane.b32.xlu0 %v2614_v50, %s2846_s11  ;;  %v416_v0 = vsel %vm2922_vm2, %v411_v58, %v415_v47  ;;  %v425_v2 = vrot.slane %v424_v60, 4  ;;  %v438_v3 = vor.u32 %v437_v63, %v434_v62  ;;  %v656_v17 = vshll.u32 %v2563_v8, 16  ;;  %v2802_v50 = vld [vmem:[%s2897_s24 + $0x108] ss:$8 sps:$4 sm:$0xff]   ;;  %v2606_v60 = vld [vmem:[%s2897_s24 + $0x2c] sm:$0x1] }
  0x3e   : > { %v2527_v1 = vcombine.low %v402_v57, %v416_v0  ;;  %v662_v18 = vshll.u32 %v2564_v9, 16  ;;  %v641_v21 = vrot.slane %v639_v12, 4  ;;  %v644_v22 = vrot.slane %v642_v13, 5  ;;  %v2803_v57 = vld [vmem:[%s2897_s24 + $0x28] ss:$8 sps:$4 sm:$0xff]  }
  0x3f   : > { %v430_v10 = vsel %vm2922_vm2, %v425_v2, %v429_v61  ;;  %v439_v11 = vrot.slane %v438_v3, 4  ;;  %v650_v27 = vrot.slane %v648_v15, 5  ;;  %v655_v28 = vrot.slane %v653_v16, 4  ;;  %v2605_v58 = vld [vmem:[%s2897_s24 + $0x28] sm:$0xf] }
  0x40   : > { %v658_v29 = vrot.slane %v656_v17, 5  ;;  %v645_v31 = vor.u32 %v644_v22, %v641_v21  ;;  %v664_v32 = vrot.slane %v662_v18, 5  ;;  %v667_v33 = vshrl.u32 %v2565_v14, 16  ;;  %v2607_v61 = vld [vmem:[%s2897_s24 + $0x30] sm:$0xf] }
  0x41   : > { %461 = vrot.lane.b32.xlu0 %v2527_v1, %s2843_s29  ;;  %v444_v20 = vsel %vm2922_vm2, %v439_v11, %v443_v4  ;;  %v670_v34 = vshll.u32 %v2565_v14, 16  ;;  %v676_v37 = vshll.u32 %v2566_v19, 16  ;;  %v681_v38 = vshrl.u32 %v2567_v23, 16  ;;  %v2608_v62 = vld [vmem:[%s2897_s24 + $0x34] sm:$0x1] }
  0x42   : > { %v2528_v25 = vcombine.low %v430_v10, %v444_v20  ;;  %v659_v36 = vor.u32 %v658_v29, %v655_v28  ;;  %v684_v39 = vshll.u32 %v2567_v23, 16  ;;  %v646_v40 = vrot.slane %v645_v31, 4  ;;  %v2609_v3 = vld [vmem:[%s2897_s24 + $0x38] sm:$0xf]  ;;  %v2610_v8 = vld [vmem:[%s2897_s24 + $0x3c] sm:$0x1] }
  0x43   : > { %v669_v41 = vrot.slane %v667_v33, 4  ;;  %v672_v42 = vrot.slane %v670_v34, 5  ;;  %v690_v43 = vshll.u32 %v2568_v24, 16  ;;  %v683_v45 = vrot.slane %v681_v38, 4  ;;  %v2804_v9 = vld [vmem:[%s2897_s24 + $0x38] ss:$8 sps:$4 sm:$0xff]  }
  0x44   : > { %463 = vrot.lane.b32.xlu1 %v2528_v25, %s2843_s29  ;;  %v660_v44 = vrot.slane %v659_v36, 4  ;;  %v686_v46 = vrot.slane %v684_v39, 5  ;;  %v651_v47 = vsel %vm2922_vm2, %v646_v40, %v650_v27  ;;  %v678_v49 = vrot.slane %v676_v37, 5  ;;  %v2805_v10 = vld [vmem:[%s2897_s24 + $0x70] ss:$8 sps:$4 sm:$0xff]  }
  0x45   : > { %507 = vrot.lane.b32.xlu0 %v2799_v6, %s2839_s25  ;;  %v673_v48 = vor.u32 %v672_v42, %v669_v41  ;;  %v692_v53 = vrot.slane %v690_v43, 5  ;;  %v888_v0 = vshrl.u32 %v2605_v58, 16  ;;  %v891_v1 = vshll.u32 %v2605_v58, 16  ;;  %v2611_v14 = vld [vmem:[%s2897_s24 + $0x40] sm:$0xf] }
  0x46   : > { %v665_v51 = vsel %vm2922_vm2, %v660_v44, %v664_v32  ;;  %v687_v52 = vor.u32 %v686_v46, %v683_v45  ;;  %v897_v2 = vshll.u32 %v2606_v60, 16  ;;  %v902_v5 = vshrl.u32 %v2607_v61, 16  ;;  %v2612_v19 = vld [vmem:[%s2897_s24 + $0x44] sm:$0x1]  ;;  %v2806_v29 = vld [vmem:[%s2897_s24 + $0x80] ss:$8 sps:$4 sm:$0xff]  }
  0x47   : > { %v2571_v54 = vcombine.low %v651_v47, %v665_v51  ;;  %v674_v55 = vrot.slane %v673_v48, 4  ;;  %v905_v6 = vshll.u32 %v2607_v61, 16  ;;  %v911_v7 = vshll.u32 %v2608_v62, 16  ;;  %v2807_v33 = vld [vmem:[%s2897_s24] ss:$8 sps:$4 sm:$0xff]  }
  0x48   : > { %509 = vrot.lane.b32.xlu1 %v2800_v26, %s2839_s25  ;;  %v688_v56 = vrot.slane %v687_v52, 4  ;;  %v890_v11 = vrot.slane %v888_v0, 4  ;;  %v893_v12 = vrot.slane %v891_v1, 5  ;;  %v899_v13 = vrot.slane %v897_v2, 5  ;;  %264 = vst.msk [vmem:[#allocation3] sm:$0xff] %vm263_vm3, %v2807_v33  ;;  %s2851_s25 = smov 64  }
  0x49   : > { %553 = vrot.lane.b32.xlu0 %v2801_v35, %s2841_s27  ;;  %v679_v59 = vsel %vm2922_vm2, %v674_v55, %v678_v49  ;;  %v916_v15 = vshrl.u32 %v2609_v3, 16  ;;  %v904_v16 = vrot.slane %v902_v5, 4  ;;  %v907_v17 = vrot.slane %v905_v6, 5  ;;  %v2808_v39 = vld [vmem:[%s2897_s24 + $0x10] ss:$8 sps:$4 sm:$0xff]  }
  0x4a   : > { %v693_v63 = vsel %vm2922_vm2, %v688_v56, %v692_v53  ;;  %v913_v18 = vrot.slane %v911_v7, 5  ;;  %v919_v20 = vshll.u32 %v2609_v3, 16  ;;  %v894_v21 = vor.u32 %v893_v12, %v890_v11  ;;  %265 = vst.msk [vmem:[#allocation3 + $0x8] sm:$0xff] %vm263_vm3, %v2808_v39  ;;  %v2810_v45 = vld [vmem:[%s2897_s24 + $0x20] ss:$8 sps:$4 sm:$0xff]  }
  0x4b   : > { %v2572_v4 = vcombine.low %v679_v59, %v693_v63  ;;  %v918_v22 = vrot.slane %v916_v15, 4  ;;  %v925_v23 = vshll.u32 %v2610_v8, 16  ;;  %v930_v24 = vshrl.u32 %v2611_v14, 16  ;;  %v2812_v48 = vld [vmem:[%s2897_s24 + $0x30] ss:$8 sps:$4 sm:$0xff]   ;;  %266 = vst.msk [vmem:[#allocation3 + $0x10] sm:$0xff] %vm263_vm3, %v2810_v45 }
  0x4c   : > { %555 = vrot.lane.b32.xlu1 %v2802_v50, %s2841_s27  ;;  %v908_v25 = vor.u32 %v907_v17, %v904_v16  ;;  %v921_v26 = vrot.slane %v919_v20, 5  ;;  %v933_v27 = vshll.u32 %v2611_v14, 16  ;;  %v939_v28 = vshll.u32 %v2612_v19, 16  ;;  %v2813_v49 = vld [vmem:[%s3654_s1 + $0x10] ss:$0 sps:$4 sm:$0x33]  }
  0x4d   : > { %710 = vrot.lane.b32.xlu0 %v2571_v54, %s2844_s30  ;;  %v895_v31 = vrot.slane %v894_v21, 4  ;;  %v932_v32 = vrot.slane %v930_v24, 4  ;;  %v927_v36 = vrot.slane %v925_v23, 5  ;;  %267 = vst.msk [vmem:[#allocation3 + $0x18] sm:$0xff] %vm263_vm3, %v2812_v48  ;;  %2762 = vmatprep.subr.msk.bf16.mxu0 %vm1016_vm4, %v2813_v49  ;;  %v1018_v51 = vsel %vm1016_vm4, %v2813_v49, 0  ;;  %s2850_s24 = smov 40  }
  0x4e   : > { %v909_v34 = vrot.slane %v908_v25, 4  ;;  %v922_v35 = vor.u32 %v921_v26, %v918_v22  ;;  %v935_v37 = vrot.slane %v933_v27, 5  ;;  %v941_v43 = vrot.slane %v939_v28, 5  ;;  %2735 = vmatpush3.bf16.msra.mxu0 %v1018_v51  ;;  %v1138_v26 = vld [vmem:[#allocation2 + $0x24] sm:$0x8] }
  0x4f   : > { %v900_v38 = vsel %vm2922_vm2, %v895_v31, %v899_v13  ;;  %v2847_v27 = vmov 0   ;;  %vm1119_vm3 = vsmask.f32 256  ;;  %v1139_v28 = vsel %vm3108_vm1, 0, %v1138_v26  ;;  %v1132_v31 = vld [vmem:[#allocation2 + $0xc] sm:$0x8] }
  0x50   : > { %712 = vrot.lane.b32.xlu1 %v2572_v4, %s2844_s30  ;;  %v914_v40 = vsel %vm2922_vm2, %v909_v34, %v913_v18  ;;  %v923_v41 = vrot.slane %v922_v35, 4  ;;  %v936_v42 = vor.u32 %v935_v37, %v932_v32  ;;  %1117 = vst.msk [vmem:[#allocation2 + $0x4] sm:$0xf] %vm1102_vm14, %v2847_v27  ;;  %1128 = vst.msk [vmem:[#allocation2 + $0x70] sm:$0xf] %vm1102_vm14, %v2847_v27  ;;  %vm1118_vm4 = vcmask 57344  }
  0x51   : > { %756 = vrot.lane.b32.xlu0 %v2803_v57, %s2842_s28  ;;  %v2615_v44 = vcombine.low %v900_v38, %v914_v40  ;;  %1140 = vst [vmem:[#allocation2 + $0x24] sm:$0x8] %v1139_v28  ;;  %v1133_v34 = vsel %vm3108_vm1, 0, %v1132_v31  ;;  %v1121_v35 = vld [vmem:[#allocation2 + $0x8] sm:$0x1] }
  0x52   : > { %v928_v46 = vsel %vm2922_vm2, %v923_v41, %v927_v36  ;;  %v937_v47 = vrot.slane %v936_v42, 4  ;;  %v1156_v36 = vld [vmem:[#allocation2 + $0x14] sm:$0x1]  ;;  %1134 = vst [vmem:[#allocation2 + $0xc] sm:$0x8] %v1133_v34 }
  0x53   : > { %v1135_v37 = vld [vmem:[#allocation2 + $0x18] sm:$0x8]  ;;  %v1159_v41 = vld [vmem:[#allocation2 + $0x20] sm:$0x1]  ;;  %v1162_v42 = vld [vmem:[#allocation2 + $0x2c] sm:$0x1] }
  0x54   : > { %758 = vrot.lane.b32.xlu1 %v2804_v9, %s2842_s28  ;;  %v942_v50 = vsel %vm2922_vm2, %v937_v47, %v941_v43  ;;  %v1136_v40 = vsel %vm3108_vm1, 0, %v1135_v37  ;;  %v1165_v45 = vld [vmem:[#allocation2 + $0x38] sm:$0x1]  ;;  %v1114_v47 = vld [vmem:[#allocation2] sm:$0x8] }
  0x55   : > { %802 = vrot.lane.b32.xlu0 %v2805_v10, %s2845_s8  ;;  %v2616_v52 = vcombine.low %v928_v46, %v942_v50  ;;  %1137 = vst [vmem:[#allocation2 + $0x18] sm:$0x8] %v1136_v40  ;;  %v1115_v48 = vsel %vm3108_vm1, 0, %v1114_v47  ;;  %v1168_v49 = vld [vmem:[#allocation2 + $0x44] sm:$0x1] }
  0x56   : > { %1116 = vst [vmem:[#allocation2] sm:$0x8] %v1115_v48  ;;  %v1144_v51 = vld [vmem:[#allocation2 + $0x3c] sm:$0x8] }
  0x58   : > { %804 = vrot.lane.b32.xlu1 %v2806_v29, %s2845_s8  ;;  %v1141_v29 = vld [vmem:[#allocation2 + $0x30] sm:$0x8] }
  0x59   : > { %959 = vrot.lane.b32.xlu0 %v2615_v44, %s2846_s11  ;;  %v1142_v32 = vsel %vm3108_vm1, 0, %v1141_v29 }
  0x5a   : > { %1143 = vst [vmem:[#allocation2 + $0x30] sm:$0x8] %v1142_v32 }
  0x5c   : > { %961 = vrot.lane.b32.xlu1 %v2616_v52, %s2846_s11  ;;  %v1145_v52 = vsel %vm3108_vm1, 0, %v1144_v51 }
  0x5d   : > { %1146 = vst [vmem:[#allocation2 + $0x3c] sm:$0x8] %v1145_v52 }
  0x87   : > { %v506_v53 = vpop.permute.xlu1 %505 }
  0x88   : > { %v298_v54 = vpop.permute.xlu0 %297 }
  0x89   : > { %310 = vst.msk [vmem:[#allocation3] sm:$0xff] %vm309_vm5, %v298_v54 }
  0x8b   : > { %v552_v55 = vpop.permute.xlu1 %551 }
  0x8c   : > { %v300_v56 = vpop.permute.xlu0 %299 }
  0x8d   : > { %311 = vst.msk [vmem:[#allocation3 + $0x8] sm:$0xff] %vm309_vm5, %v300_v56  ;;  %v1153_v56 = vld [vmem:[#allocation2 + $0x60] sm:$0x8] }
  0x8f   : > { %v755_v57 = vpop.permute.xlu1 %754 }
  0x90   : > { %v504_v58 = vpop.permute.xlu0 %503 }
  0x94   : > { %v550_v60 = vpop.permute.xlu0 %549 }
  0x95   : > { %v458_v59 = vpop.permute.xlu1 %457 }
  0x96   : > { %470 = vst.msk [vmem:[#allocation3] sm:$0xff] %vm469_vm6, %v458_v59  ;;  %v1125_v59 = vld [vmem:[#allocation2 + $0x6c] sm:$0x8] }
  0x97   : > { %516 = vst.msk [vmem:[#allocation3] sm:$0xff] %vm515_vm7, %v504_v58  ;;  %v1154_v58 = vsel %vm3108_vm1, 0, %v1153_v56  ;;  %v3183_v56 = vld [vmem:[#allocation2 + $0x4] sm:$0xf] }
  0x98   : > { %562 = vst.msk [vmem:[#allocation3] sm:$0xff] %vm561_vm8, %v550_v60  ;;  %v753_v62 = vpop.permute.xlu0 %752  ;;  %1155 = vst [vmem:[#allocation2 + $0x60] sm:$0x8] %v1154_v58  ;;  %v1174_v60 = vld [vmem:[#allocation2 + $0x5c] sm:$0x1] }
  0x99   : > { %v460_v61 = vpop.permute.xlu1 %459 }
  0x9a   : > { %471 = vst.msk [vmem:[#allocation3 + $0x8] sm:$0xff] %vm469_vm6, %v460_v61  ;;  %v1126_v61 = vsel %vm3108_vm1, 0, %v1125_v59 }
  0x9b   : > { %517 = vst.msk [vmem:[#allocation3 + $0x8] sm:$0xff] %vm515_vm7, %v506_v53  ;;  %v1147_v53 = vld [vmem:[#allocation2 + $0x48] sm:$0x8]  ;;  %1127 = vst [vmem:[#allocation2 + $0x6c] sm:$0x8] %v1126_v61 }
  0x9c   : > { %563 = vst.msk [vmem:[#allocation3 + $0x8] sm:$0xff] %vm561_vm8, %v552_v55  ;;  %v1148_v54 = vsel %vm3108_vm1, 0, %v1147_v53  ;;  %v1150_v55 = vld [vmem:[#allocation2 + $0x54] sm:$0x8] }
  0x9d   : > { %1149 = vst [vmem:[#allocation2 + $0x48] sm:$0x8] %v1148_v54 }
  0x9f   : > { %v709_v63 = vpop.permute.xlu1 %708 }
  0xa0   : > { %720 = vst.msk [vmem:[#allocation3 + $0x8] sm:$0xff] %vm718_vm9, %v709_v63  ;;  %v1171_v63 = vld [vmem:[#allocation2 + $0x50] sm:$0x1] }
  0xa1   : > { %766 = vst.msk [vmem:[#allocation3 + $0x8] sm:$0xff] %vm764_vm10, %v755_v57  ;;  %v1151_v57 = vsel %vm3108_vm1, 0, %v1150_v55  ;;  %v1881_v55 = vld [vmem:[#allocation2 + $0x30] sm:$0x8]  ;;  %vm2223_vm1 = vcmask 589312  }
  0xa2   : > { %1152 = vst [vmem:[#allocation2 + $0x54] sm:$0x8] %v1151_v57 }
  0xa3   : > { %v801_v0 = vpop.permute.xlu1 %800  ;;  %v707_v1 = vpop.permute.xlu0 %706 }
  0xa4   : > { %812 = vst.msk [vmem:[#allocation3 + $0x8] sm:$0xff] %vm810_vm11, %v801_v0 }
  0xa5   : > { %719 = vst.msk [vmem:[#allocation3] sm:$0xff] %vm718_vm9, %v707_v1  ;;  %v1177_v1 = vld [vmem:[#allocation2 + $0x68] sm:$0x1] }
  0xa6   : > { %765 = vst.msk [vmem:[#allocation3] sm:$0xff] %vm764_vm10, %v753_v62 }
  0xa7   : > { %v302_v2 = vpop.permute.xlu1 %301  ;;  %v799_v3 = vpop.permute.xlu0 %798 }
  0xa8   : > { %312 = vst.msk [vmem:[#allocation3 + $0x10] sm:$0xff] %vm309_vm5, %v302_v2  ;;  %v1129_v2 = vld [vmem:[#allocation2 + $0x74] sm:$0x1] }
  0xa9   : > { %811 = vst.msk [vmem:[#allocation3] sm:$0xff] %vm810_vm11, %v799_v3 }
  0xab   : > { %v304_v4 = vpop.permute.xlu1 %303  ;;  %v956_v5 = vpop.permute.xlu0 %955 }
  0xac   : > { %313 = vst.msk [vmem:[#allocation3 + $0x18] sm:$0xff] %vm309_vm5, %v304_v4  ;;  %vm3119_vm5 = vmand %vm1118_vm4, %vm1119_vm3 }
  0xad   : > { %968 = vst.msk [vmem:[#allocation3] sm:$0xff] %vm967_vm12, %v956_v5  ;;  %v1122_v38 = vsel %vm3119_vm5, 0, %v1121_v35  ;;  %v1157_v39 = vsel %vm3119_vm5, 0, %v1156_v36  ;;  %v1160_v43 = vsel %vm3119_vm5, 0, %v1159_v41  ;;  %v1163_v44 = vsel %vm3119_vm5, 0, %v1162_v42 }
  0xae   : > { %1123 = vst [vmem:[#allocation2 + $0x8] sm:$0x1] %v1122_v38  ;;  %1158 = vst [vmem:[#allocation2 + $0x14] sm:$0x1] %v1157_v39  ;;  %v1166_v46 = vsel %vm3119_vm5, 0, %v1165_v45  ;;  %v1169_v50 = vsel %vm3119_vm5, 0, %v1168_v49 }
  0xaf   : > { %v958_v6 = vpop.permute.xlu0 %957  ;;  %1161 = vst [vmem:[#allocation2 + $0x20] sm:$0x1] %v1160_v43  ;;  %1164 = vst [vmem:[#allocation2 + $0x2c] sm:$0x1] %v1163_v44  ;;  %v1175_v62 = vsel %vm3119_vm5, 0, %v1174_v60  ;;  %v1172_v0 = vsel %vm3119_vm5, 0, %v1171_v63 }
  0xb0   : > { %969 = vst.msk [vmem:[#allocation3 + $0x8] sm:$0xff] %vm967_vm12, %v958_v6  ;;  %1167 = vst [vmem:[#allocation2 + $0x38] sm:$0x1] %v1166_v46  ;;  %v1178_v3 = vsel %vm3119_vm5, 0, %v1177_v1  ;;  %v1130_v4 = vsel %vm3119_vm5, 0, %v1129_v2  ;;  %v1920_v2 = vshrl.u32 %v1881_v55, 16 }
  0xb1   : > { %1170 = vst [vmem:[#allocation2 + $0x44] sm:$0x1] %v1169_v50  ;;  %1176 = vst [vmem:[#allocation2 + $0x5c] sm:$0x1] %v1175_v62  ;;  %v1368_v5 = vld [vmem:[#allocation2 + $0x4] sm:$0xf] }
  0xb2   : > { %1173 = vst [vmem:[#allocation2 + $0x50] sm:$0x1] %v1172_v0  ;;  %1179 = vst [vmem:[#allocation2 + $0x68] sm:$0x1] %v1178_v3  ;;  %v1385_v6 = vshrl.u32 %v1368_v5, 16 }
  0xb3   : > { %v462_v7 = vpop.permute.xlu0 %461  ;;  %1131 = vst [vmem:[#allocation2 + $0x74] sm:$0x1] %v1130_v4  ;;  %v1180_v0 = vld [vmem:[#allocation2] sm:$0x8]  ;;  %v1182_v3 = vld [vmem:[#allocation2 + $0xc] sm:$0x8] }
  0xb4   : > { %v972_v8 = vld [vmem:[#allocation3] sm:$0xff]  ;;  %472 = vst.msk [vmem:[#allocation3 + $0x10] sm:$0xff] %vm469_vm6, %v462_v7  ;;  %v1388_v7 = vshll.u32 %v1368_v5, 16  ;;  %v1204_v4 = vshrl.u32 %v3183_v56, 16 }
  0xb5   : > { %2736 = vmatprep.mubr.msk.bf16.mxu0 %vm1003_vm13, %v972_v8  ;;  %v1529_v8 = vld [vmem:[#allocation2 + $0x24] sm:$0x8] }
  0xb6   : > { %v464_v9 = vpop.permute.xlu1 %463  ;;  %v1722_v27 = vld [vmem:[#allocation2 + $0x20] sm:$0x1]  ;;  %v1724_v28 = vld [vmem:[#allocation2 + $0x2c] sm:$0x1] }
  0xb7   : > { %v508_v10 = vpop.permute.xlu0 %507  ;;  %v973_v11 = vld [vmem:[#allocation3 + $0x8] sm:$0xff]  ;;  %473 = vst.msk [vmem:[#allocation3 + $0x18] sm:$0xff] %vm469_vm6, %v464_v9  ;;  %v1531_v9 = vld [vmem:[#allocation2 + $0x30] sm:$0x8]  ;;  %v1726_v29 = vld [vmem:[#allocation2 + $0x38] sm:$0x1] }
  0xb8   : > { %518 = vst.msk [vmem:[#allocation3 + $0x10] sm:$0xff] %vm515_vm7, %v508_v10  ;;  %2737 = vmatmul.mubr.msk.bf16.vlgmr.msra.gmra.mrb[0].mxu0 %vm1003_vm13, %v973_v11  ;;  %v1525_v10 = vld [vmem:[#allocation2 + $0xc] sm:$0x8]  ;;  %v1369_v11 = vld [vmem:[#allocation2 + $0x8] sm:$0x1]  ;;  %v1759_v38 = vshll.u32 %v1722_v27, 16 }
  0xb9   : > { %v2072_v31 = vld [vmem:[#allocation2 + $0x20] sm:$0x1]  ;;  %v2074_v32 = vld [vmem:[#allocation2 + $0x2c] sm:$0x1]  ;;  %v1773_v39 = vshll.u32 %v1724_v28, 16  ;;  %v1787_v41 = vshll.u32 %v1726_v29, 16 }
  0xba   : > { %v510_v12 = vpop.permute.xlu1 %509  ;;  %v2097_v42 = vshll.u32 %v2072_v31, 16  ;;  %v2111_v43 = vshll.u32 %v2074_v32, 16  ;;  %v2076_v48 = vld [vmem:[#allocation2 + $0x38] sm:$0x1]  ;;  %v1373_v51 = vld [vmem:[#allocation2 + $0x20] sm:$0x1] }
  0xbb   : > { %v554_v13 = vpop.permute.xlu0 %553  ;;  %519 = vst.msk [vmem:[#allocation3 + $0x18] sm:$0xff] %vm515_vm7, %v510_v12  ;;  %v1371_v12 = vld [vmem:[#allocation2 + $0x14] sm:$0x1]  ;;  %v1375_v52 = vld [vmem:[#allocation2 + $0x2c] sm:$0x1]  ;;  %v3179_v53 = vrot.slane %v1759_v38, 5 }
  0xbc   : > { %564 = vst.msk [vmem:[#allocation3 + $0x10] sm:$0xff] %vm561_vm8, %v554_v13  ;;  %v1387_v13 = vrot.slane %v1385_v6, 4  ;;  %v3181_v54 = vrot.slane %v1773_v39, 5  ;;  %v3185_v57 = vrot.slane %v1787_v41, 5  ;;  %v3187_v58 = vrot.slane %v2097_v42, 5 }
  0xbd   : > { %v3189_v59 = vrot.slane %v2111_v43, 5  ;;  %v2125_v60 = vshll.u32 %v2076_v48, 16  ;;  %v1422_v61 = vshll.u32 %v1373_v51, 16  ;;  %v1436_v62 = vshll.u32 %v1375_v52, 16  ;;  %v1377_v63 = vld [vmem:[#allocation2 + $0x38] sm:$0x1] }
  0xbe   : > { %v556_v14 = vpop.permute.xlu1 %555  ;;  %v2078_v1 = vld [vmem:[#allocation2 + $0x44] sm:$0x1]  ;;  %v1883_v6 = vld [vmem:[#allocation2 + $0x3c] sm:$0x8]  ;;  %v1537_v27 = vld [vmem:[#allocation2 + $0x54] sm:$0x8] }
  0xbf   : > { %v711_v15 = vpop.permute.xlu0 %710  ;;  %565 = vst.msk [vmem:[#allocation3 + $0x18] sm:$0xff] %vm561_vm8, %v556_v14  ;;  %v1390_v14 = vrot.slane %v1388_v7, 5  ;;  %v1379_v5 = vld [vmem:[#allocation2 + $0x44] sm:$0x1]  ;;  %v3192_v7 = vld [vmem:[#allocation2 + $0x70] sm:$0xf] }
  0xc0   : > { %721 = vst.msk [vmem:[#allocation3 + $0x10] sm:$0xff] %vm718_vm9, %v711_v15  ;;  %v1527_v15 = vld [vmem:[#allocation2 + $0x18] sm:$0x8]  ;;  %vm1196_vm6 = vsmask.f32 4368  ;;  %vm1318_vm8 = vcmask 64512  }
  0xc1   : > { %v1555_v25 = vshrl.u32 %v1527_v15, 16  ;;  %v1885_v15 = vld [vmem:[#allocation2 + $0x48] sm:$0x8]  ;;  %vm3304_vm7 = vmor %vm1119_vm3, %vm1196_vm6  ;;  %vm2275_vm3 = vcmask 588800  }
  0xc2   : > { %v713_v16 = vpop.permute.xlu1 %712  ;;  %v1946_v28 = vshrl.u32 %v1885_v15, 16 }
  0xc3   : > { %v757_v17 = vpop.permute.xlu0 %756  ;;  %722 = vst.msk [vmem:[#allocation3 + $0x18] sm:$0xff] %vm718_vm9, %v713_v16  ;;  %v1879_v16 = vld [vmem:[#allocation2 + $0x24] sm:$0x8]  ;;  %v3171_v46 = vrot.slane %v1555_v25, 11  ;;  %v3208_v25 = vrot.slane %v1204_v4, 7  ;;  %vm1363_vm9 = vcmask 130112  }
  0xc4   : > { %767 = vst.msk [vmem:[#allocation3 + $0x10] sm:$0xff] %vm764_vm10, %v757_v17  ;;  %v1568_v17 = vshrl.u32 %v1529_v8, 16  ;;  %v1907_v26 = vshrl.u32 %v1879_v16, 16  ;;  %v1450_v8 = vshll.u32 %v1377_v63, 16  ;;  %v1212_v16 = vshrl.u32 %v1182_v3, 16 }
  0xc5   : > { %v1728_v4 = vld [vmem:[#allocation2 + $0x44] sm:$0x1] }
  0xc6   : > { %v759_v18 = vpop.permute.xlu1 %758  ;;  %v3159_v33 = vrot.slane %v1568_v17, 11  ;;  %v3173_v47 = vrot.slane %v1907_v26, 11  ;;  %v3198_v17 = vrot.slane %v1436_v62, 5  ;;  %v3210_v26 = vrot.slane %v1450_v8, 5  ;;  %v1889_v62 = vld [vmem:[#allocation2 + $0x60] sm:$0x8] }
  0xc7   : > { %v803_v19 = vpop.permute.xlu0 %802  ;;  %768 = vst.msk [vmem:[#allocation3 + $0x18] sm:$0xff] %vm764_vm10, %v759_v18  ;;  %v1581_v18 = vshrl.u32 %v1531_v9, 16  ;;  %v1533_v9 = vld [vmem:[#allocation2 + $0x3c] sm:$0x8]  ;;  %v3217_v38 = vrot.slane %v1212_v16, 11  ;;  %v1972_v15 = vshrl.u32 %v1889_v62, 16 }
  0xc8   : > { %813 = vst.msk [vmem:[#allocation3 + $0x10] sm:$0xff] %vm810_vm11, %v803_v19  ;;  %v1542_v19 = vshrl.u32 %v1525_v10, 16  ;;  %v1535_v10 = vld [vmem:[#allocation2 + $0x48] sm:$0x8]  ;;  %v2082_v16 = vld [vmem:[#allocation2 + $0x5c] sm:$0x1] }
  0xc9   : > { %v3161_v36 = vrot.slane %v1581_v18, 11  ;;  %v1464_v18 = vshll.u32 %v1379_v5, 16  ;;  %3669 = vst [vmem:[#allocation5_spill] sm:$0xff] %v3217_v38  ;;  %v2167_v48 = vshll.u32 %v2082_v16, 16  ;;  %vm1520_vm10 = vcmask 195712  }
  0xca   : > { %v805_v20 = vpop.permute.xlu1 %804  ;;  %v3163_v37 = vrot.slane %v1542_v19, 11  ;;  %v1933_v19 = vshrl.u32 %v1883_v6, 16 }
  0xcb   : > { %v960_v21 = vpop.permute.xlu0 %959  ;;  %814 = vst.msk [vmem:[#allocation3 + $0x18] sm:$0xff] %vm810_vm11, %v805_v20  ;;  %v1394_v20 = vshll.u32 %v1369_v11, 16  ;;  %v1199_v11 = vshrl.u32 %v1180_v0, 16  ;;  %v3219_v41 = vrot.slane %v1464_v18, 5  ;;  %v1383_v18 = vld [vmem:[#allocation2 + $0x5c] sm:$0x1] }
  0xcc   : > { %970 = vst.msk [vmem:[#allocation3 + $0x10] sm:$0xff] %vm967_vm12, %v960_v21  ;;  %v1408_v21 = vshll.u32 %v1371_v12, 16  ;;  %v3194_v12 = vrot.slane %v2125_v60, 5  ;;  %v3221_v42 = vrot.slane %v1933_v19, 11  ;;  %v1492_v62 = vshll.u32 %v1383_v18, 16 }
  0xcd   : > { %v3167_v44 = vrot.slane %v1394_v20, 5  ;;  %v1990_v20 = vshrl.u32 %v3192_v7, 16  ;;  %v3212_v29 = vrot.slane %v1199_v11, 11  ;;  %v3262_v18 = vld [vmem:[#allocation2 + $0x68] sm:$0x1]  ;;  %vm1669_vm11 = vcmask 261312  }
  0xce   : > { %v962_v22 = vpop.permute.xlu1 %961  ;;  %v3169_v45 = vrot.slane %v1408_v21, 5  ;;  %v3204_v21 = vld [vmem:[%s3655_s2] ss:$0 sm:$0xff] }
  0xcf   : > { %971 = vst.msk [vmem:[#allocation3 + $0x18] sm:$0xff] %vm967_vm12, %v962_v22  ;;  %v1877_v22 = vld [vmem:[#allocation2 + $0x18] sm:$0x8]  ;;  %v3223_v43 = vrot.slane %v1990_v20, 7  ;;  %vm1714_vm12 = vcmask 326912  }
  0xd0   : > { %v1894_v34 = vshrl.u32 %v1877_v22, 16  ;;  %v3206_v22 = vrot.slane %v1920_v2, 11  ;;  %v3236_v2 = vrot.slane %v1946_v28, 11 }
  0xd2   : > { %v3175_v49 = vrot.slane %v1894_v34, 11  ;;  %v1539_v34 = vld [vmem:[#allocation2 + $0x60] sm:$0x8]  ;;  %3673 = vst [vmem:[#allocation9_spill] sm:$0xff] %v3236_v2 }
  0xd3   : > { %v974_v23 = vld [vmem:[#allocation3 + $0x10] sm:$0xff] }
  0xd4   : > { %2740 = vmatprep.mubr.msk.bf16.mxu0 %vm1003_vm13, %v974_v23  ;;  %v1720_v23 = vld [vmem:[#allocation2 + $0x14] sm:$0x1] }
  0xd5   : > { %v1745_v35 = vshll.u32 %v1720_v23, 16  ;;  %v1594_v23 = vshrl.u32 %v1533_v9, 16  ;;  %v1891_v9 = vld [vmem:[#allocation2 + $0x6c] sm:$0x8] }
  0xd6   : > { %v975_v24 = vld [vmem:[#allocation3 + $0x18] sm:$0xff] }
  0xd7   : > { %2741 = vmatmul.mubr.msk.bf16.gmra.mrb[4].mxu0 %vm1003_vm13, %v975_v24  ;;  %v1391_v24 = vor.u32 %v1390_v14, %v1387_v13  ;;  %v3177_v50 = vrot.slane %v1745_v35, 5  ;;  %v2139_v13 = vshll.u32 %v2078_v1, 16  ;;  %v3196_v14 = vrot.slane %v1422_v61, 5  ;;  %v1887_v35 = vld [vmem:[#allocation2 + $0x54] sm:$0x8] }
  0xd8   : > { %v3229_v55 = vrot.slane %v1594_v23, 11  ;;  %v1620_v61 = vshrl.u32 %v1537_v27, 16  ;;  %v1633_v1 = vshrl.u32 %v1539_v34, 16  ;;  %v1959_v3 = vshrl.u32 %v1887_v35, 16  ;;  %v1730_v23 = vld [vmem:[#allocation2 + $0x50] sm:$0x1] }
  0xd9   : > { %v3165_v40 = vrot.slane %v1391_v24, 4  ;;  %v1607_v24 = vshrl.u32 %v1535_v10, 16  ;;  %v3215_v32 = vrot.slane %v2139_v13, 5  ;;  %v1732_v10 = vld [vmem:[#allocation2 + $0x5c] sm:$0x1]  ;;  %v1985_v35 = vshrl.u32 %v1891_v9, 16 }
  0xda   : > { %v2080_v27 = vld [vmem:[#allocation2 + $0x50] sm:$0x1]  ;;  %v3250_v31 = vrot.slane %v1620_v61, 11  ;;  %v3255_v9 = vrot.slane %v1959_v3, 11  ;;  %v3264_v61 = vld [vmem:[#allocation2 + $0x68] sm:$0x1] }
  0xdb   : > { %v3231_v60 = vrot.slane %v1607_v24, 11  ;;  %v1801_v24 = vshll.u32 %v1728_v4, 16  ;;  %v2153_v4 = vshll.u32 %v2080_v27, 16  ;;  %v3272_v3 = vrot.slane %v1492_v62, 5  ;;  %v3286_v62 = vld [vmem:[#allocation2 + $0x24] sm:$0x8] }
  0xdc   : > { %3676 = vst [vmem:[#allocation12_spill] sm:$0xff] %v3250_v31  ;;  %3678 = vst [vmem:[#allocation14_spill] sm:$0xff] %v3255_v9  ;;  %vm1871_vm13 = vcmask 392512  }
  0xdd   : > { %3671 = vst [vmem:[#allocation7_spill] sm:$0xff] %v3231_v60  ;;  %v3260_v16 = vrot.slane %v1801_v24, 5  ;;  %3683 = vst [vmem:[#allocation19_spill] sm:$0xff] %v3272_v3 }
  0xdf   : > { %3680 = vst [vmem:[#allocation16_spill] sm:$0xff] %v3260_v16 }
 0x18b   : > { %v2738_v39 = vpop.f32.mrb[0].mxu0 }
 0x18c   : > { %v3227_v51 = vadd.f32 %v2738_v39, %v3204_v21  ;;  %v1054_v52 = vpop.f32.mrb[1].mxu0  ;;  %v1381_v39 = vld [vmem:[#allocation2 + $0x50] sm:$0x1] }
 0x18d   : > { %v3234_v63 = vadd.f32 %v3204_v21, %v1054_v52  ;;  %v2739_v0 = vpop.f32.mrb[2].mxu0  ;;  %v2085_v52 = vld [vmem:[#allocation2 + $0x70] sm:$0xf] }
 0x18e   : > { %3670 = vst [vmem:[#allocation6_spill] sm:$0xff] %v3227_v51  ;;  %v1087_v5 = vmax.f32 %v3227_v51, 0.0  ;;  %v3240_v6 = vadd.f32 %v2739_v0, %v3204_v21  ;;  %v1057_v8 = vpop.f32.mrb[3].mxu0  ;;  %v2186_v51 = vshrl.u32 %v2085_v52, 16 }
 0x18f   : > { %3672 = vst [vmem:[#allocation8_spill] sm:$0xff] %v3234_v63  ;;  %v1085_v11 = vmax.f32 %v3234_v63, 0.0  ;;  %v3244_v13 = vadd.f32 %v3204_v21, %v1057_v8  ;;  %v1829_v8 = vshll.u32 %v1732_v10, 16  ;;  %v3258_v10 = vrot.slane %v1972_v15, 11 }
 0x190   : > { %3674 = vst [vmem:[#allocation10_spill] sm:$0xff] %v3240_v6  ;;  %v1095_v19 = vpack.c.bf16 %v1087_v5, %v1087_v5  ;;  %v1088_v20 = vmax.f32 %v3240_v6, 0.0  ;;  %v1815_v6 = vshll.u32 %v1730_v23, 16  ;;  %v2189_v15 = vshll.u32 %v2085_v52, 16 }
 0x191   : > { %3675 = vst [vmem:[#allocation11_spill] sm:$0xff] %v3244_v13  ;;  %v1093_v28 = vpack.c.bf16 %v1085_v11, %v1085_v11  ;;  %v1086_v34 = vmax.f32 %v3244_v13, 0.0  ;;  %v3253_v11 = vrot.slane %v1633_v1, 11  ;;  %v1478_v13 = vshll.u32 %v1381_v39, 16  ;;  %3679 = vst [vmem:[#allocation15_spill] sm:$0xff] %v3258_v10 }
 0x192   : > { %1105 = vst.msk [vmem:[#allocation2 + $0x28] sm:$0xf] %vm1102_vm14, %v1095_v19  ;;  %v1096_v0 = vpack.c.bf16 %v1088_v20, %v1088_v20  ;;  %v1184_v19 = vld [vmem:[#allocation2 + $0x18] sm:$0x8]  ;;  %v3266_v20 = vrot.slane %v1985_v35, 11  ;;  %v3268_v23 = vrot.slane %v1829_v8, 5  ;;  %v1397_v63 = vsel %vm2922_vm2, %v3165_v40, %v3167_v44 }
 0x193   : > { %1103 = vst.msk [vmem:[#allocation2 + $0x10] sm:$0xf] %vm1102_vm14, %v1093_v28  ;;  %v1094_v5 = vpack.c.bf16 %v1086_v34, %v1086_v34  ;;  %3677 = vst [vmem:[#allocation13_spill] sm:$0xff] %v3253_v11  ;;  %v3270_v1 = vrot.slane %v2167_v48, 5  ;;  %v3274_v27 = vrot.slane %v1815_v6, 5  ;;  %v3276_v28 = vrot.slane %v2153_v4, 5 }
 0x194   : > { %1106 = vst.msk [vmem:[#allocation2 + $0x34] sm:$0xf] %vm1102_vm14, %v1096_v0  ;;  %3681 = vst [vmem:[#allocation17_spill] sm:$0xff] %v3268_v23  ;;  %v1225_v24 = vshrl.u32 %v1184_v19, 16  ;;  %v3279_v39 = vrot.slane %v1478_v13, 5  ;;  %v3282_v0 = vrot.slane %v2186_v51, 4 }
 0x195   : > { %1104 = vst.msk [vmem:[#allocation2 + $0x1c] sm:$0xf] %vm1102_vm14, %v1094_v5  ;;  %3682 = vst [vmem:[#allocation18_spill] sm:$0xff] %v3270_v1  ;;  %v3284_v8 = vld [vmem:[#allocation2 + $0x74] sm:$0x1]  ;;  %v3289_v4 = vrot.slane %v2189_v15, 5 }
 0x196   : > { %3684 = vst [vmem:[#allocation20_spill] sm:$0xff] %v3274_v27  ;;  %3685 = vst [vmem:[#allocation21_spill] sm:$0xff] %v3276_v28  ;;  %v3291_v52 = vrot.slane %v1225_v24, 11  ;;  %v3690_v24 = vshll.u32 %v3183_v56, 16 }
 0x197   : > { %3686 = vst [vmem:[#allocation22_spill] sm:$0xff] %v3279_v39 }
 0x198   : > { %3687 = vst [vmem:[#allocation23_spill] sm:$0xff] %v3291_v52 }
 0x199   : > { %v1530_v6 = vld [vmem:[#allocation2 + $0x28] sm:$0xf] }
 0x19a   : > { %v2814_v48 = vld [vmem:[#allocation2 + $0x4] ss:$12 sps:$4 sm:$0xff]   ;;  %v1573_v51 = vshrl.u32 %v1530_v6, 16  ;;  %v1576_v52 = vshll.u32 %v1530_v6, 16  ;;  %v1880_v6 = vld [vmem:[#allocation2 + $0x28] sm:$0xf] }
 0x19b   : > { %v2815_v5 = vld [vmem:[#allocation2 + $0x28] ss:$12 sps:$4 sm:$0xff]   ;;  %1351 = vrot.lane.b32.xlu0 %v2814_v48, %s2843_s29  ;;  %v1370_v34 = vld [vmem:[#allocation2 + $0x10] sm:$0xf]  ;;  %v1912_v60 = vshrl.u32 %v1880_v6, 16 }
 0x19c   : > { %1704 = vrot.lane.b32.xlu1 %v2815_v5, %s2846_s11  ;;  %v2816_v13 = vld [vmem:[#allocation2 + $0x10] ss:$12 sps:$4 sm:$0xff]   ;;  %v1532_v35 = vld [vmem:[#allocation2 + $0x34] sm:$0xf]  ;;  %v1399_v48 = vshrl.u32 %v1370_v34, 16  ;;  %v1402_v15 = vshll.u32 %v1370_v34, 16 }
 0x19d   : > { %v2817_v19 = vld [vmem:[#allocation2 + $0x1c] ss:$12 sps:$4 sm:$0xff]   ;;  %v1586_v3 = vshrl.u32 %v1532_v35, 16  ;;  %v1526_v39 = vld [vmem:[#allocation2 + $0x10] sm:$0xf]  ;;  %v1575_v5 = vrot.slane %v1573_v51, 7 }
 0x19e   : > { %v1589_v1 = vshll.u32 %v1532_v35, 16  ;;  %v1528_v28 = vld [vmem:[#allocation2 + $0x1c] sm:$0xf]  ;;  %v1547_v23 = vshrl.u32 %v1526_v39, 16  ;;  %v1401_v16 = vrot.slane %v1399_v48, 4  ;;  %v1404_v40 = vrot.slane %v1402_v15, 5 }
 0x19f   : > { %1702 = vrot.lane.b32.xlu0 %v2816_v13, %s2846_s11  ;;  %v1588_v27 = vrot.slane %v1586_v3, 7  ;;  %v1560_v44 = vshrl.u32 %v1528_v28, 16  ;;  %v1878_v38 = vld [vmem:[#allocation2 + $0x1c] sm:$0xf]  ;;  %v1578_v13 = vor.u32 %v1576_v52, %v1575_v5  ;;  %v1563_v9 = vshll.u32 %v1528_v28, 16 }
 0x1a0   : > { %1353 = vrot.lane.b32.xlu1 %v2817_v19, %s2843_s29  ;;  %v2818_v10 = vld [vmem:[#allocation2 + $0x1c] ss:$12 sps:$4 sm:$0xff]   ;;  %v1549_v51 = vrot.slane %v1547_v23, 7  ;;  %v1899_v35 = vshrl.u32 %v1878_v38, 16  ;;  %v3311_v19 = vor.u32 %v3690_v24, %v3208_v25  ;;  %v1405_v48 = vor.u32 %v1404_v40, %v1401_v16  ;;  %v1719_v52 = vld [vmem:[#allocation2 + $0x10] sm:$0xf] }
 0x1a1   : > { %v1591_v3 = vor.u32 %v1589_v1, %v1588_v27  ;;  %v1562_v15 = vrot.slane %v1560_v44, 7  ;;  %v1550_v2 = vshll.u32 %v1526_v39, 16  ;;  %v1902_v31 = vshll.u32 %v1878_v38, 16  ;;  %v1725_v40 = vld [vmem:[#allocation2 + $0x34] sm:$0xf] }
 0x1a2   : > { %v1901_v11 = vrot.slane %v1899_v35, 7  ;;  %v1579_v23 = vsel %vm3304_vm7, %v3159_v33, %v1578_v13  ;;  %v1406_v25 = vrot.slane %v1405_v48, 4  ;;  %v1914_v28 = vrot.slane %v1912_v60, 7  ;;  %v3327_v13 = vld [vmem:[#allocation2 + $0x30] sm:$0x8] }
 0x1a3   : > { %2054 = vrot.lane.b32.xlu0 %v2818_v10, %s2848_s16  ;;  %v1592_v56 = vsel %vm3304_vm7, %v3161_v36, %v1591_v3  ;;  %v1565_v16 = vor.u32 %v1563_v9, %v1562_v15  ;;  %v1552_v27 = vor.u32 %v1550_v2, %v1549_v51  ;;  %v1915_v24 = vshll.u32 %v1880_v6, 16  ;;  %v1721_v10 = vld [vmem:[#allocation2 + $0x1c] sm:$0xf]  ;;  %v1723_v51 = vld [vmem:[#allocation2 + $0x28] sm:$0xf] }
 0x1a4   : > { %v2654_v1 = vcombine.low %v1579_v23, %v1592_v56  ;;  %v1411_v38 = vsel %vm2922_vm2, %v1406_v25, %v3169_v45  ;;  %v1904_v39 = vor.u32 %v1902_v31, %v1901_v11  ;;  %v1736_v5 = vshrl.u32 %v1719_v52, 16  ;;  %v2071_v25 = vld [vmem:[#allocation2 + $0x1c] sm:$0xf] }
 0x1a5   : > { %v3691_v33 = vshll.u32 %v3262_v18, 16  ;;  %v2641_v36 = vcombine.low %v1397_v63, %v1411_v38  ;;  %v1566_v60 = vsel %vm3304_vm7, %v3171_v46, %v1565_v16  ;;  %v1917_v2 = vor.u32 %v1915_v24, %v1914_v28 }
 0x1a6   : > { %1659 = vrot.lane.b32.xlu1 %v2654_v1, %s2842_s28  ;;  %v1739_v9 = vshll.u32 %v1719_v52, 16  ;;  %v1750_v45 = vshrl.u32 %v1721_v10, 16  ;;  %v1753_v31 = vshll.u32 %v1721_v10, 16  ;;  %v3692_v11 = vshll.u32 %v3264_v61, 16 }
 0x1a7   : > { %v3325_v44 = vrot.slane %v3691_v33, 5  ;;  %v2192_v18 = vor.u32 %v3289_v4, %v3282_v0  ;;  %1508 = vrot.lane.b32.xlu0 %v2641_v36, %s2841_s27  ;;  %v1553_v63 = vsel %vm3304_vm7, %v3163_v37, %v1552_v27  ;;  %v1778_v35 = vshrl.u32 %v1725_v40, 16 }
 0x1a8   : > { %v3335_v6 = vrot.slane %v3692_v11, 5  ;;  %v3693_v46 = vshll.u32 %v3284_v8, 16  ;;  %v2653_v61 = vcombine.low %v1553_v63, %v1566_v60  ;;  %v1905_v52 = vsel %vm3304_vm7, %v3175_v49, %v1904_v39  ;;  %v2073_v63 = vld [vmem:[#allocation2 + $0x28] sm:$0xf] }
 0x1a9   : > { %v3351_v23 = vrot.slane %v1736_v5, 4  ;;  %v1764_v56 = vshrl.u32 %v1723_v51, 16  ;;  %v1918_v8 = vsel %vm3304_vm7, %v3173_v47, %v1917_v2  ;;  %v1741_v1 = vrot.slane %v1739_v9, 5 }
 0x1aa   : > { %v3345_v3 = vrot.slane %v3693_v46, 5  ;;  %v2742_v15 = vpop.f32.mrb[4].mxu0  ;;  %v1767_v27 = vshll.u32 %v1723_v51, 16  ;;  %v1752_v10 = vrot.slane %v1750_v45, 4  ;;  %v1755_v49 = vrot.slane %v1753_v31, 5 }
 0x1ab   : > { %v3354_v16 = vadd.f32 %v2742_v15, %v3204_v21  ;;  %v1070_v37 = vpop.f32.mrb[5].mxu0  ;;  %v1781_v38 = vshll.u32 %v1725_v40, 16  ;;  %1657 = vrot.lane.b32.xlu0 %v2653_v61, %s2842_s28  ;;  %v1780_v36 = vrot.slane %v1778_v35, 4  ;;  %v2088_v60 = vshrl.u32 %v2071_v25, 16  ;;  %v2075_v35 = vld [vmem:[#allocation2 + $0x34] sm:$0xf] }
 0x1ac   : > { %v3360_v28 = vadd.f32 %v3204_v21, %v1070_v37  ;;  %v2743_v24 = vpop.f32.mrb[6].mxu0  ;;  %v2673_v9 = vcombine.low %v1905_v52, %v1918_v8  ;;  %v1766_v51 = vrot.slane %v1764_v56, 4  ;;  %v1769_v31 = vrot.slane %v1767_v27, 5  ;;  %v1372_v37 = vld [vmem:[#allocation2 + $0x1c] sm:$0xf] }
 0x1ad   : > { %v1091_v39 = vmax.f32 %v3354_v16, 0.0  ;;  %v3364_v5 = vadd.f32 %v2743_v24, %v3204_v21  ;;  %v1073_v33 = vpop.f32.mrb[7].mxu0  ;;  %v1783_v11 = vrot.slane %v1781_v38, 5  ;;  %v1742_v61 = vor.u32 %v1741_v1, %v3351_v23 }
 0x1ae   : > { %v1089_v47 = vmax.f32 %v3360_v28, 0.0  ;;  %v3369_v2 = vadd.f32 %v3204_v21, %v1073_v33  ;;  %v3694_v24 = vshrl.u32 %v3286_v62, 16  ;;  %v1756_v52 = vor.u32 %v1755_v49, %v1752_v10  ;;  %v1374_v10 = vld [vmem:[#allocation2 + $0x28] sm:$0xf] }
 0x1af   : > { %v1099_v45 = vpack.c.bf16 %v1091_v39, %v1091_v39  ;;  %v1092_v40 = vmax.f32 %v3364_v5, 0.0  ;;  %2009 = vrot.lane.b32.xlu0 %v2673_v9, %s2849_s17  ;;  %v1784_v56 = vor.u32 %v1783_v11, %v1780_v36  ;;  %v2090_v8 = vrot.slane %v2088_v60, 4 }
 0x1b0   : > { %v1097_v46 = vpack.c.bf16 %v1089_v47, %v1089_v47  ;;  %v1090_v15 = vmax.f32 %v3369_v2, 0.0  ;;  %v3376_v48 = vrot.slane %v3694_v24, 11  ;;  %v2091_v38 = vshll.u32 %v2071_v25, 16 }
 0x1b1   : > { %1109 = vst.msk [vmem:[#allocation2 + $0x58] sm:$0xf] %vm1102_vm14, %v1099_v45  ;;  %v1100_v21 = vpack.c.bf16 %v1092_v40, %v1092_v40  ;;  %v2102_v23 = vshrl.u32 %v2073_v63, 16  ;;  %v2105_v1 = vshll.u32 %v2073_v63, 16  ;;  %v1770_v62 = vor.u32 %v1769_v31, %v1766_v51 }
 0x1b2   : > { %1107 = vst.msk [vmem:[#allocation2 + $0x40] sm:$0xf] %vm1102_vm14, %v1097_v46  ;;  %v1098_v27 = vpack.c.bf16 %v1090_v15, %v1090_v15  ;;  %v2116_v39 = vshrl.u32 %v2075_v35, 16  ;;  %v2119_v33 = vshll.u32 %v2075_v35, 16  ;;  %v1413_v47 = vshrl.u32 %v1372_v37, 16 }
 0x1b3   : > { %1110 = vst.msk [vmem:[#allocation2 + $0x64] sm:$0xf] %vm1102_vm14, %v1100_v21  ;;  %v2093_v45 = vrot.slane %v2091_v38, 5  ;;  %v2104_v40 = vrot.slane %v2102_v23, 4  ;;  %v2107_v9 = vrot.slane %v2105_v1, 5  ;;  %v1416_v49 = vshll.u32 %v1372_v37, 16 }
 0x1b4   : > { %1108 = vst.msk [vmem:[#allocation2 + $0x4c] sm:$0xf] %vm1102_vm14, %v1098_v27  ;;  %v1757_v36 = vrot.slane %v1756_v52, 4  ;;  %v1785_v60 = vrot.slane %v1784_v56, 4  ;;  %v2118_v11 = vrot.slane %v2116_v39, 4  ;;  %v2121_v46 = vrot.slane %v2119_v33, 5 }
 0x1b5   : > { %v2094_v25 = vor.u32 %v2093_v45, %v2090_v8  ;;  %v2108_v15 = vor.u32 %v2107_v9, %v2104_v40  ;;  %v1415_v63 = vrot.slane %v1413_v47, 4  ;;  %v1418_v24 = vrot.slane %v1416_v49, 5  ;;  %v1376_v35 = vld [vmem:[#allocation2 + $0x34] sm:$0xf] }
 0x1b6   : > { %v1743_v21 = vrot.slane %v1742_v61, 4  ;;  %v1771_v51 = vrot.slane %v1770_v62, 4  ;;  %v1427_v31 = vshrl.u32 %v1374_v10, 16  ;;  %v3386_v27 = vrot.slane %v2192_v18, 4  ;;  %v1882_v49 = vld [vmem:[#allocation2 + $0x34] sm:$0xf] }
 0x1b7   : > { %v2095_v38 = vrot.slane %v2094_v25, 4  ;;  %v2109_v23 = vrot.slane %v2108_v15, 4  ;;  %v1762_v52 = vsel %vm2922_vm2, %v1757_v36, %v3179_v53  ;;  %v1790_v56 = vsel %vm2922_vm2, %v1785_v60, %v3185_v57 }
 0x1b8   : > { %v2122_v61 = vor.u32 %v2121_v46, %v2118_v11  ;;  %v3695_v8 = vshll.u32 %v3192_v7, 16  ;;  %v1419_v4 = vor.u32 %v1418_v24, %v1415_v63  ;;  %v1430_v18 = vshll.u32 %v1374_v10, 16 }
 0x1b9   : > { %v2819_v37 = vld [vmem:[#allocation2 + $0x34] ss:$12 sps:$4 sm:$0xff]   ;;  %v2100_v0 = vsel %vm2922_vm2, %v2095_v38, %v3187_v58  ;;  %v1441_v62 = vshrl.u32 %v1376_v35, 16  ;;  %v1210_v57 = vsel %vm3304_vm7, %v3212_v29, %v3311_v19  ;;  %v1748_v7 = vsel %vm2922_vm2, %v1743_v21, %v3177_v50  ;;  %v3712_v19 = vld [vmem:[#allocation23_spill] sm:$0xff] }
 0x1ba   : > { %v3397_v1 = vor.u32 %v3695_v8, %v3223_v43  ;;  %2056 = vrot.lane.b32.xlu1 %v2819_v37, %s2848_s16  ;;  %v2821_v39 = vld [vmem:[#allocation2 + $0x34] ss:$12 sps:$4 sm:$0xff]   ;;  %v1776_v58 = vsel %vm2922_vm2, %v1771_v51, %v3181_v54  ;;  %v2114_v43 = vsel %vm2922_vm2, %v2109_v23, %v3189_v59  ;;  %v3696_v33 = vshrl.u32 %v3327_v13, 16  ;;  %v2823_v37 = vld [vmem:[#allocation2 + $0x58] ss:$12 sps:$4 sm:$0xff]  }
 0x1bb   : > { %v2820_v53 = vld [vmem:[#allocation2 + $0x40] ss:$12 sps:$4 sm:$0xff]   ;;  %v2661_v40 = vcombine.low %v1748_v7, %v1762_v52  ;;  %v2662_v9 = vcombine.low %v1776_v58, %v1790_v56  ;;  %v3421_v10 = vcombine.low %v2100_v0, %v2114_v43  ;;  %v2123_v36 = vrot.slane %v2122_v61, 4 }
 0x1bc   : > { %v3418_v47 = vrot.slane %v3696_v33, 11  ;;  %1706 = vrot.lane.b32.xlu0 %v2820_v53, %s2846_s11  ;;  %v2822_v45 = vld [vmem:[#allocation2 + $0x4c] ss:$12 sps:$4 sm:$0xff]   ;;  %v2077_v50 = vld [vmem:[#allocation2 + $0x40] sm:$0xf]  ;;  %v1996_v54 = vsel %vm3304_vm7, %v3266_v20, %v3397_v1  ;;  %v1420_v13 = vrot.slane %v1419_v4, 4 }
 0x1bd   : > { %v2130_v59 = vshrl.u32 %v2077_v50, 16  ;;  %v2133_v60 = vshll.u32 %v2077_v50, 16  ;;  %v1378_v11 = vld [vmem:[#allocation2 + $0x40] sm:$0xf]  ;;  %v1429_v46 = vrot.slane %v1427_v31, 4  ;;  %v1432_v25 = vrot.slane %v1430_v18, 5 }
 0x1be   : > { %1355 = vrot.lane.b32.xlu1 %v2821_v39, %s2843_s29  ;;  %v1443_v15 = vrot.slane %v1441_v62, 4  ;;  %v1444_v63 = vshll.u32 %v1376_v35, 16  ;;  %v1884_v24 = vld [vmem:[#allocation2 + $0x40] sm:$0xf]  ;;  %v2128_v21 = vsel %vm2922_vm2, %v2123_v36, %v3194_v12  ;;  %v1425_v23 = vsel %vm2922_vm2, %v1420_v13, %v3196_v14  ;;  %v2827_v14 = vld [vmem:[%s3656_s3 + $0x8] sm:$0xff]   ;;  %v3703_v1 = vld [vmem:[#allocation16_spill] sm:$0xff] }
 0x1bf   : > { %v2132_v51 = vrot.slane %v2130_v59, 4  ;;  %v2135_v38 = vrot.slane %v2133_v60, 5  ;;  %v1433_v52 = vor.u32 %v1432_v25, %v1429_v46  ;;  %v1455_v31 = vshrl.u32 %v1378_v11, 16  ;;  %v2826_v35 = vld [vmem:[%s3656_s3] sm:$0xff]   ;;  %v1536_v59 = vld [vmem:[#allocation2 + $0x4c] sm:$0xf] }
 0x1c0   : > { %2058 = vrot.lane.b32.xlu0 %v2822_v45, %s2848_s16  ;;  %v1446_v56 = vrot.slane %v1444_v63, 5  ;;  %v1458_v61 = vshll.u32 %v1378_v11, 16  ;;  %v1925_v0 = vshrl.u32 %v1882_v49, 16  ;;  %v1928_v12 = vshll.u32 %v1882_v49, 16  ;;  %v1534_v18 = vld [vmem:[#allocation2 + $0x40] sm:$0xf]  ;;  %2744 = vmatprep.subr.bf16.mxu1 %v2826_v35 }
 0x1c1   : > { %v2136_v8 = vor.u32 %v2135_v38, %v2132_v51  ;;  %v1938_v4 = vshrl.u32 %v1884_v24, 16  ;;  %v1434_v62 = vrot.slane %v1433_v52, 4  ;;  %v1457_v39 = vrot.slane %v1455_v31, 4  ;;  %2745 = vmatpush3.bf16.msra.mxu1 %v2826_v35  ;;  %v1540_v52 = vld [vmem:[#allocation2 + $0x64] sm:$0xf] }
 0x1c2   : > { %1708 = vrot.lane.b32.xlu1 %v2823_v37, %s2846_s11  ;;  %v1447_v53 = vor.u32 %v1446_v56, %v1443_v15  ;;  %v1460_v7 = vrot.slane %v1458_v61, 5  ;;  %v1927_v43 = vrot.slane %v1925_v0, 7  ;;  %v1941_v45 = vshll.u32 %v1884_v24, 16  ;;  %2746 = vmatprep.subr.bf16.mxu1 %v2827_v14  ;;  %v1538_v15 = vld [vmem:[#allocation2 + $0x58] sm:$0xf] }
 0x1c3   : > { %v2137_v58 = vrot.slane %v2136_v8, 4  ;;  %v1940_v33 = vrot.slane %v1938_v4, 7  ;;  %v1439_v50 = vsel %vm2922_vm2, %v1434_v62, %v3198_v17  ;;  %v1599_v60 = vshrl.u32 %v1534_v18, 16  ;;  %v1888_v31 = vld [vmem:[#allocation2 + $0x58] sm:$0xf] }
 0x1c4   : > { %1859 = vrot.lane.b32.xlu0 %v2661_v40, %s2850_s24  ;;  %v1448_v49 = vrot.slane %v1447_v53, 4  ;;  %v1461_v36 = vor.u32 %v1460_v7, %v1457_v39  ;;  %v2642_v11 = vcombine.low %v1425_v23, %v1439_v50  ;;  %v1930_v46 = vor.u32 %v1928_v12, %v1927_v43  ;;  %v2824_v40 = vld [vmem:[#allocation2 + $0x4c] ss:$12 sps:$4 sm:$0xff]   ;;  %v2828_v39 = vld [vmem:[%s3656_s3 + $0x10] sm:$0xff]  }
 0x1c5   : > { %v2142_v13 = vsel %vm2922_vm2, %v2137_v58, %v3215_v32  ;;  %v1943_v25 = vor.u32 %v1941_v45, %v1940_v33  ;;  %v1601_v51 = vrot.slane %v1599_v60, 7  ;;  %v1602_v23 = vshll.u32 %v1534_v18, 16  ;;  %2747 = vmatpush3.bf16.msra.mxu1 %v2827_v14  ;;  %v1890_v14 = vld [vmem:[#allocation2 + $0x64] sm:$0xf]  ;;  %v1727_v45 = vld [vmem:[#allocation2 + $0x40] sm:$0xf] }
 0x1c6   : > { %1861 = vrot.lane.b32.xlu1 %v2662_v9, %s2850_s24  ;;  %v2682_v63 = vcombine.low %v2128_v21, %v2142_v13  ;;  %v1453_v17 = vsel %vm2922_vm2, %v1448_v49, %v3210_v26  ;;  %v1462_v24 = vrot.slane %v1461_v36, 4  ;;  %v1931_v38 = vsel %vm3304_vm7, %v3206_v22, %v1930_v46  ;;  %v1886_v9 = vld [vmem:[#allocation2 + $0x4c] sm:$0xf]  ;;  %v2829_v50 = vld [vmem:[%s3656_s3 + $0x18] sm:$0xff]   ;;  %2748 = vmatprep.subr.bf16.mxu1 %v2828_v39 }
 0x1c7   : > { %v1944_v32 = vsel %vm3304_vm7, %v3221_v42, %v1943_v25  ;;  %v1612_v37 = vshrl.u32 %v1536_v59, 16  ;;  %v1615_v56 = vshll.u32 %v1536_v59, 16  ;;  %v1625_v22 = vshrl.u32 %v1538_v15, 16  ;;  %v3697_v49 = vld [vmem:[#allocation7_spill] sm:$0xff]  ;;  %v3698_v25 = vld [vmem:[#allocation12_spill] sm:$0xff] }
 0x1c8   : > { %2211 = vrot.lane.b32.xlu0 %v3421_v10, %s2851_s25  ;;  %v1467_v26 = vsel %vm2922_vm2, %v1462_v24, %v3219_v41  ;;  %v2674_v21 = vcombine.low %v1931_v38, %v1944_v32  ;;  %v1604_v35 = vor.u32 %v1602_v23, %v1601_v51  ;;  %v1628_v8 = vshll.u32 %v1538_v15, 16  ;;  %v1729_v13 = vld [vmem:[#allocation2 + $0x4c] sm:$0xf]  ;;  %v3699_v32 = vld [vmem:[#allocation13_spill] sm:$0xff] }
 0x1c9   : > { %v2643_v61 = vcombine.low %v1453_v17, %v1467_v26  ;;  %v1614_v42 = vrot.slane %v1612_v37, 7  ;;  %v1627_v0 = vrot.slane %v1625_v22, 7  ;;  %v1638_v12 = vshrl.u32 %v1540_v52, 16  ;;  %2749 = vmatpush3.bf16.msra.mxu1 %v2828_v39  ;;  %v3700_v37 = vld [vmem:[#allocation9_spill] sm:$0xff]  ;;  %v1380_v20 = vld [vmem:[#allocation2 + $0x4c] sm:$0xf] }
 0x1ca   : > { %1357 = vrot.lane.b32.xlu1 %v2824_v40, %s2843_s29  ;;  %v1641_v4 = vshll.u32 %v1540_v52, 16  ;;  %v1951_v18 = vshrl.u32 %v1886_v9, 16  ;;  %v1605_v10 = vsel %vm3304_vm7, %v3229_v55, %v1604_v35  ;;  %v1954_v62 = vshll.u32 %v1886_v9, 16  ;;  %v1731_v26 = vld [vmem:[#allocation2 + $0x58] sm:$0xf]  ;;  %2750 = vmatprep.subr.bf16.mxu1 %v2829_v50 }
 0x1cb   : > { %v1617_v41 = vor.u32 %v1615_v56, %v1614_v42  ;;  %v1964_v53 = vshrl.u32 %v1888_v31, 16  ;;  %v1630_v7 = vor.u32 %v1628_v8, %v1627_v0  ;;  %v1640_v58 = vrot.slane %v1638_v12, 7  ;;  %v1733_v56 = vld [vmem:[#allocation2 + $0x64] sm:$0xf] }
 0x1cc   : > { %2213 = vrot.lane.b32.xlu0 %v2682_v63, %s2851_s25  ;;  %v1953_v43 = vrot.slane %v1951_v18, 7  ;;  %v1967_v33 = vshll.u32 %v1888_v31, 16  ;;  %v1977_v59 = vshrl.u32 %v1890_v14, 16  ;;  %v1980_v60 = vshll.u32 %v1890_v14, 16  ;;  %v3701_v31 = vld [vmem:[#allocation14_spill] sm:$0xff]  ;;  %v3702_v14 = vld [vmem:[#allocation15_spill] sm:$0xff] }
 0x1cd   : > { %v1618_v55 = vsel %vm3304_vm7, %v3697_v49, %v1617_v41  ;;  %v1966_v36 = vrot.slane %v1964_v53, 7  ;;  %v1631_v15 = vsel %vm3304_vm7, %v3698_v25, %v1630_v7  ;;  %v1643_v40 = vor.u32 %v1641_v4, %v1640_v58  ;;  %v2079_v18 = vld [vmem:[#allocation2 + $0x4c] sm:$0xf]  ;;  %2751 = vmatpush3.bf16.msra.mxu1 %v2829_v50 }
 0x1ce   : > { %1510 = vrot.lane.b32.xlu1 %v2642_v11, %s2841_s27  ;;  %v2655_v46 = vcombine.low %v1605_v10, %v1618_v55  ;;  %v1956_v63 = vor.u32 %v1954_v62, %v1953_v43  ;;  %v1979_v24 = vrot.slane %v1977_v59, 7  ;;  %v1792_v51 = vshrl.u32 %v1727_v45, 16  ;;  %v2081_v43 = vld [vmem:[#allocation2 + $0x58] sm:$0xf] }
 0x1cf   : > { %v1969_v17 = vor.u32 %v1967_v33, %v1966_v36  ;;  %v1795_v38 = vshll.u32 %v1727_v45, 16  ;;  %v1644_v23 = vsel %vm3304_vm7, %v3699_v32, %v1643_v40  ;;  %v1806_v52 = vshrl.u32 %v1729_v13, 16  ;;  %v3704_v40 = vld [vmem:[#allocation20_spill] sm:$0xff] }
 0x1d0   : > { %1512 = vrot.lane.b32.xlu0 %v2643_v61, %s2841_s27  ;;  %v1957_v11 = vsel %vm3304_vm7, %v3700_v37, %v1956_v63  ;;  %v1809_v9 = vshll.u32 %v1729_v13, 16  ;;  %v2656_v22 = vcombine.low %v1631_v15, %v1644_v23  ;;  %v1982_v42 = vor.u32 %v1980_v60, %v1979_v24 }
 0x1d1   : > { %v1970_v35 = vsel %vm3304_vm7, %v3701_v31, %v1969_v17  ;;  %v1794_v61 = vrot.slane %v1792_v51, 4  ;;  %v1797_v0 = vrot.slane %v1795_v38, 5  ;;  %v1808_v12 = vrot.slane %v1806_v52, 4  ;;  %v1382_v51 = vld [vmem:[#allocation2 + $0x58] sm:$0xf] }
 0x1d2   : > { %2011 = vrot.lane.b32.xlu1 %v2674_v21, %s2849_s17  ;;  %v2675_v8 = vcombine.low %v1957_v11, %v1970_v35  ;;  %v1811_v4 = vrot.slane %v1809_v9, 5  ;;  %v1983_v10 = vsel %vm3304_vm7, %v3702_v14, %v1982_v42  ;;  %v1820_v41 = vshrl.u32 %v1731_v26, 16  ;;  %v1183_v14 = vld [vmem:[#allocation2 + $0x10] sm:$0xf] }
 0x1d3   : > { %v1823_v62 = vshll.u32 %v1731_v26, 16  ;;  %v1834_v53 = vshrl.u32 %v1733_v56, 16  ;;  %v2676_v21 = vcombine.low %v1983_v10, %v1996_v54  ;;  %v1798_v39 = vor.u32 %v1797_v0, %v1794_v61  ;;  %v2083_v61 = vld [vmem:[#allocation2 + $0x64] sm:$0xf] }
 0x1d4   : > { %1661 = vrot.lane.b32.xlu0 %v2655_v46, %s2842_s28  ;;  %v1812_v7 = vor.u32 %v1811_v4, %v1808_v12  ;;  %v1837_v58 = vshll.u32 %v1733_v56, 16  ;;  %v1822_v33 = vrot.slane %v1820_v41, 4  ;;  %v2144_v55 = vshrl.u32 %v2079_v18, 16  ;;  %v3705_v56 = vld [vmem:[#allocation17_spill] sm:$0xff] }
 0x1d5   : > { %v1825_v45 = vrot.slane %v1823_v62, 5  ;;  %v1836_v49 = vrot.slane %v1834_v53, 4  ;;  %v1799_v36 = vrot.slane %v1798_v39, 4  ;;  %v2147_v60 = vshll.u32 %v2079_v18, 16 }
 0x1d6   : > { %1663 = vrot.lane.b32.xlu1 %v2656_v22, %s2842_s28  ;;  %v1813_v50 = vrot.slane %v1812_v7, 4  ;;  %v1839_v59 = vrot.slane %v1837_v58, 5  ;;  %v2146_v46 = vrot.slane %v2144_v55, 4  ;;  %v2158_v25 = vshrl.u32 %v2081_v43, 16  ;;  %s2852_s28 = smov 120  }
 0x1d7   : > { %v1826_v13 = vor.u32 %v1825_v45, %v1822_v33  ;;  %v2161_v15 = vshll.u32 %v2081_v43, 16  ;;  %v1804_v54 = vsel %vm2922_vm2, %v1799_v36, %v3703_v1  ;;  %v2149_v24 = vrot.slane %v2147_v60, 5  ;;  %v1187_v33 = vld [vmem:[#allocation2 + $0x28] sm:$0xf]  ;;  %v1185_v36 = vld [vmem:[#allocation2 + $0x1c] sm:$0xf] }
 0x1d8   : > { %2013 = vrot.lane.b32.xlu0 %v2675_v8, %s2849_s17  ;;  %v1818_v63 = vsel %vm2922_vm2, %v1813_v50, %v3704_v40  ;;  %v1840_v17 = vor.u32 %v1839_v59, %v1836_v49  ;;  %v2160_v23 = vrot.slane %v2158_v25, 4  ;;  %v1469_v9 = vshrl.u32 %v1380_v20, 16  ;;  %v1190_v8 = vld [vmem:[#allocation2 + $0x3c] sm:$0x8]  ;;  %v3708_v40 = vld [vmem:[#allocation22_spill] sm:$0xff] }
 0x1d9   : > { %v2663_v38 = vcombine.low %v1804_v54, %v1818_v63  ;;  %v1827_v32 = vrot.slane %v1826_v13, 4  ;;  %v2163_v37 = vrot.slane %v2161_v15, 5  ;;  %v2150_v52 = vor.u32 %v2149_v24, %v2146_v46  ;;  %v1189_v54 = vld [vmem:[#allocation2 + $0x34] sm:$0xf] }
 0x1da   : > { %2015 = vrot.lane.b32.xlu1 %v2676_v21, %s2849_s17  ;;  %v1841_v11 = vrot.slane %v1840_v17, 4  ;;  %v1472_v26 = vshll.u32 %v1380_v20, 16  ;;  %v1483_v35 = vshrl.u32 %v1382_v51, 16  ;;  %v1486_v42 = vshll.u32 %v1382_v51, 16  ;;  %v3706_v21 = vld [vmem:[#allocation21_spill] sm:$0xff] }
 0x1db   : > { %v1832_v22 = vsel %vm2922_vm2, %v1827_v32, %v3705_v56  ;;  %v2164_v31 = vor.u32 %v2163_v37, %v2160_v23  ;;  %v2151_v12 = vrot.slane %v2150_v52, 4  ;;  %v1471_v4 = vrot.slane %v1469_v9, 4  ;;  %v1192_v32 = vld [vmem:[#allocation2 + $0x48] sm:$0x8] }
 0x1dc   : > { %1863 = vrot.lane.b32.xlu0 %v2663_v38, %s2850_s24  ;;  %v1846_v0 = vsel %vm2922_vm2, %v1841_v11, %v3325_v44  ;;  %v1474_v18 = vrot.slane %v1472_v26, 5  ;;  %v1485_v62 = vrot.slane %v1483_v35, 4  ;;  %v1488_v53 = vrot.slane %v1486_v42, 5  ;;  %v3707_v44 = vld [vmem:[#allocation18_spill] sm:$0xff]  ;;  %v3709_v23 = vld [vmem:[#allocation19_spill] sm:$0xff]  ;;  %v3710_v35 = vld [vmem:[#allocation5_spill] sm:$0xff] }
 0x1dd   : > { %v2664_v10 = vcombine.low %v1832_v22, %v1846_v0  ;;  %v2165_v41 = vrot.slane %v2164_v31, 4  ;;  %v2156_v39 = vsel %vm2922_vm2, %v2151_v12, %v3706_v21  ;;  %v2172_v58 = vshrl.u32 %v2083_v61, 16  ;;  %v1191_v38 = vld [vmem:[#allocation2 + $0x40] sm:$0xf]  ;;  %v3711_v12 = vld [vmem:[#allocation8_spill] sm:$0xff] }
 0x1de   : > { %v1475_v7 = vor.u32 %v1474_v18, %v1471_v4  ;;  %v2175_v43 = vshll.u32 %v2083_v61, 16  ;;  %v1489_v49 = vor.u32 %v1488_v53, %v1485_v62  ;;  %v1217_v55 = vshrl.u32 %v1183_v14, 16 }
 0x1df   : > { %1865 = vrot.lane.b32.xlu1 %v2664_v10, %s2850_s24  ;;  %v2170_v45 = vsel %vm2922_vm2, %v2165_v41, %v3707_v44  ;;  %v1264_v50 = vshrl.u32 %v1190_v8, 16  ;;  %v2174_v13 = vrot.slane %v2172_v58, 4  ;;  %v1220_v20 = vshll.u32 %v1183_v14, 16  ;;  %v1194_v41 = vld [vmem:[#allocation2 + $0x54] sm:$0x8] }
 0x1e0   : > { %v2683_v59 = vcombine.low %v2156_v39, %v2170_v45  ;;  %v1476_v60 = vrot.slane %v1475_v7, 4  ;;  %v2177_v46 = vrot.slane %v2175_v43, 5  ;;  %v1490_v25 = vrot.slane %v1489_v49, 4  ;;  %v1193_v7 = vld [vmem:[#allocation2 + $0x4c] sm:$0xf] }
 0x1e1   : > { %v1219_v15 = vrot.slane %v1217_v55, 7  ;;  %v1243_v1 = vshrl.u32 %v1187_v33, 16  ;;  %v1246_v24 = vshll.u32 %v1187_v33, 16  ;;  %v1230_v51 = vshrl.u32 %v1185_v36, 16  ;;  %v2825_v58 = vld [vmem:[#allocation2 + $0x64] ss:$12 sps:$4 sm:$0xff]  }
 0x1e2   : > { %2215 = vrot.lane.b32.xlu0 %v2683_v59, %s2851_s25  ;;  %v1481_v63 = vsel %vm2922_vm2, %v1476_v60, %v3708_v40  ;;  %v2178_v17 = vor.u32 %v2177_v46, %v2174_v13  ;;  %v1495_v37 = vsel %vm2922_vm2, %v1490_v25, %v3709_v23  ;;  %v1233_v9 = vshll.u32 %v1185_v36, 16 }
 0x1e3   : > { %v1222_v11 = vor.u32 %v1220_v20, %v1219_v15  ;;  %v1245_v52 = vrot.slane %v1243_v1, 7  ;;  %v2644_v26 = vcombine.low %v1481_v63, %v1495_v37  ;;  %v1232_v22 = vrot.slane %v1230_v51, 7 }
 0x1e4   : > { %v2179_v56 = vrot.slane %v2178_v17, 4  ;;  %v1256_v31 = vshrl.u32 %v1189_v54, 16  ;;  %v1269_v8 = vshrl.u32 %v1191_v38, 16  ;;  %v1277_v0 = vshrl.u32 %v1192_v32, 16  ;;  %v3714_v17 = vld [vmem:[#allocation11_spill] sm:$0xff] }
 0x1e5   : > { %v1223_v42 = vsel %vm3304_vm7, %v3710_v35, %v1222_v11  ;;  %v1248_v61 = vor.u32 %v1246_v24, %v1245_v52  ;;  %1514 = vrot.lane.b32.xlu1 %v2644_v26, %s2841_s27  ;;  %v1235_v18 = vor.u32 %v1233_v9, %v1232_v22  ;;  %v1259_v10 = vshll.u32 %v1189_v54, 16 }
 0x1e6   : > { %2365 = vrot.lane.b32.xlu0 %v3711_v12, %s2852_s28  ;;  %v2633_v4 = vcombine.low %v1210_v57, %v1223_v42  ;;  %v1258_v14 = vrot.slane %v1256_v31, 7  ;;  %v2198_v62 = vsel %vm2922_vm2, %v3386_v27, %v3345_v3  ;;  %v2630_v53 = vrot.slane %v1264_v50, 11  ;;  %v1195_v27 = vld [vmem:[#allocation2 + $0x58] sm:$0xf] }
 0x1e7   : > { %v1271_v21 = vrot.slane %v1269_v8, 7  ;;  %v1272_v39 = vshll.u32 %v1191_v38, 16  ;;  %v2184_v43 = vsel %vm2922_vm2, %v2179_v56, %v3335_v6  ;;  %v1249_v29 = vsel %vm3304_vm7, %v3376_v48, %v1248_v61  ;;  %v3713_v6 = vld [vmem:[#allocation6_spill] sm:$0xff] }
 0x1e8   : > { %1319 = vst.msk [vmem:[#allocation4] sm:$0xff] %vm1318_vm8, %v2633_v4  ;;  %v1236_v57 = vsel %vm3304_vm7, %v3712_v19, %v1235_v18  ;;  %v1261_v3 = vor.u32 %v1259_v10, %v1258_v14  ;;  %v1290_v45 = vshrl.u32 %v1194_v41, 16  ;;  %v2631_v49 = vrot.slane %v1277_v0, 11 }
 0x1e9   : > { %v2634_v33 = vcombine.low %v1236_v57, %v1249_v29  ;;  %v1274_v44 = vor.u32 %v1272_v39, %v1271_v21  ;;  %2060 = vrot.lane.b32.xlu1 %v2825_v58, %s2848_s16  ;;  %v1282_v48 = vshrl.u32 %v1193_v7, 16  ;;  %v2684_v55 = vcombine.low %v2184_v43, %v2198_v62 }
 0x1ea   : > { %2369 = vrot.lane.b32.xlu0 %v3713_v6, %s2852_s28  ;;  %v1262_v36 = vsel %vm3304_vm7, %v3418_v47, %v1261_v3  ;;  %v1295_v59 = vshrl.u32 %v1195_v27, 16  ;;  %v1285_v46 = vshll.u32 %v1193_v7, 16  ;;  %vm2288_vm2 = vcmask 1043456  }
 0x1eb   : > { %1320 = vst.msk [vmem:[#allocation4 + $0x8] sm:$0xff] %vm1318_vm8, %v2634_v33  ;;  %v1275_v50 = vsel %vm3304_vm7, %v2630_v53, %v1274_v44  ;;  %v1284_v13 = vrot.slane %v1282_v48, 7  ;;  %v2632_v25 = vrot.slane %v1290_v45, 11  ;;  %v1298_v20 = vshll.u32 %v1195_v27, 16  ;;  %2763 = vmatprep.subr.msk.bf16.mxu1 %vm2288_vm2, %v2830_v30  ;;  %v2685_v27 = vld [vmem:[%s3657_s4] ss:$0 sm:$0xff] }
 0x1ec   : > { %v2635_v60 = vcombine.low %v1262_v36, %v1275_v50  ;;  %v1297_v15 = vrot.slane %v1295_v59, 7  ;;  %v2290_v1 = vsel %vm2288_vm2, %v2830_v30, 0 }
 0x1ed   : > { %2217 = vrot.lane.b32.xlu1 %v2684_v55, %s2851_s25  ;;  %v1287_v47 = vor.u32 %v1285_v46, %v1284_v13  ;;  %2753 = vmatpush3.bf16.msra.mxu1 %v2290_v1 }
 0x1ee   : > { %2373 = vrot.lane.b32.xlu0 %v3360_v28, %s2852_s28  ;;  %1321 = vst.msk [vmem:[#allocation4 + $0x10] sm:$0xff] %vm1318_vm8, %v2635_v60  ;;  %v1300_v54 = vor.u32 %v1298_v20, %v1297_v15  ;;  %v3715_v28 = vld [vmem:[#allocation10_spill] sm:$0xff] }
 0x1ef   : > { %v1288_v40 = vsel %vm3304_vm7, %v2631_v49, %v1287_v47 }
 0x1f0   : > { %v1301_v63 = vsel %vm3304_vm7, %v2632_v25, %v1300_v54 }
 0x1f1   : > { %2367 = vrot.lane.b32.xlu1 %v3714_v17, %s2852_s28  ;;  %v2636_v24 = vcombine.low %v1288_v40, %v1301_v63 }
 0x1f2   : > { %2377 = vrot.lane.b32.xlu0 %v3354_v16, %s2852_s28 }
 0x1f3   : > { %1322 = vst.msk [vmem:[#allocation4 + $0x18] sm:$0xff] %vm1318_vm8, %v2636_v24 }
 0x1f5   : > { %2371 = vrot.lane.b32.xlu1 %v3715_v28, %s2852_s28 }
 0x1f9   : > { %2375 = vrot.lane.b32.xlu1 %v3369_v2, %s2852_s28 }
 0x1fd   : > { %2379 = vrot.lane.b32.xlu1 %v3364_v5, %s2852_s28 }
 0x20d   : > { %v1352_v34 = vpop.permute.xlu0 %1351 }
 0x20e   : > { %1364 = vst.msk [vmem:[#allocation4] sm:$0xff] %vm1363_vm9, %v1352_v34  ;;  %v1705_v51 = vpop.permute.xlu1 %1704 }
 0x211   : > { %v1703_v38 = vpop.permute.xlu0 %1702 }
 0x212   : > { %v1354_v32 = vpop.permute.xlu1 %1353 }
 0x213   : > { %1365 = vst.msk [vmem:[#allocation4 + $0x8] sm:$0xff] %vm1363_vm9, %v1354_v32 }
 0x215   : > { %v2055_v16 = vpop.permute.xlu0 %2054 }
 0x218   : > { %v1660_v5 = vpop.permute.xlu1 %1659 }
 0x219   : > { %v1509_v23 = vpop.permute.xlu0 %1508 }
 0x21a   : > { %1521 = vst.msk [vmem:[#allocation4] sm:$0xff] %vm1520_vm10, %v1509_v23 }
 0x21d   : > { %v1658_v2 = vpop.permute.xlu0 %1657 }
 0x21e   : > { %1670 = vst.msk [vmem:[#allocation4] sm:$0xff] %vm1669_vm11, %v1658_v2 }
 0x21f   : > { %1715 = vst.msk [vmem:[#allocation4] sm:$0xff] %vm1714_vm12, %v1703_v38 }
 0x221   : > { %v2010_v37 = vpop.permute.xlu0 %2009 }
 0x22c   : > { %v2057_v11 = vpop.permute.xlu1 %2056 }
 0x22e   : > { %v1707_v52 = vpop.permute.xlu0 %1706 }
 0x230   : > { %v1356_v9 = vpop.permute.xlu1 %1355 }
 0x231   : > { %1366 = vst.msk [vmem:[#allocation4 + $0x10] sm:$0xff] %vm1363_vm9, %v1356_v9 }
 0x232   : > { %v2059_v26 = vpop.permute.xlu0 %2058 }
 0x234   : > { %v1709_v56 = vpop.permute.xlu1 %1708 }
 0x236   : > { %v1860_v22 = vpop.permute.xlu0 %1859 }
 0x237   : > { %1872 = vst.msk [vmem:[#allocation4] sm:$0xff] %vm1871_vm13, %v1860_v22 }
 0x238   : > { %2022 = vst.msk [vmem:[#allocation4] sm:$0xff] %vm2021_vm15, %v2010_v37  ;;  %v1862_v31 = vpop.permute.xlu1 %1861 }
 0x239   : > { %2067 = vst.msk [vmem:[#allocation4] sm:$0xff] %vm2066_vm0, %v2055_v16 }
 0x23a   : > { %v2212_v35 = vpop.permute.xlu0 %2211 }
 0x23b   : > { %2224 = vst.msk [vmem:[#allocation4] sm:$0xff] %vm2223_vm1, %v2212_v35 }
 0x23c   : > { %v1358_v42 = vpop.permute.xlu1 %1357 }
 0x23d   : > { %1367 = vst.msk [vmem:[#allocation4 + $0x18] sm:$0xff] %vm1363_vm9, %v1358_v42 }
 0x23e   : > { %v2214_v61 = vpop.permute.xlu0 %2213 }
 0x240   : > { %v1511_v8 = vpop.permute.xlu1 %1510 }
 0x241   : > { %1522 = vst.msk [vmem:[#allocation4 + $0x8] sm:$0xff] %vm1520_vm10, %v1511_v8 }
 0x242   : > { %1671 = vst.msk [vmem:[#allocation4 + $0x8] sm:$0xff] %vm1669_vm11, %v1660_v5  ;;  %v1513_v0 = vpop.permute.xlu0 %1512  ;;  %v2228_v12 = vld [vmem:[#allocation4] sm:$0xff] }
 0x243   : > { %1716 = vst.msk [vmem:[#allocation4 + $0x8] sm:$0xff] %vm1714_vm12, %v1705_v51  ;;  %2754 = vmatprep.mubr.msk.bf16.mxu1 %vm2275_vm3, %v2228_v12 }
 0x244   : > { %1523 = vst.msk [vmem:[#allocation4 + $0x10] sm:$0xff] %vm1520_vm10, %v1513_v0  ;;  %v2012_v4 = vpop.permute.xlu1 %2011 }
 0x245   : > { %1873 = vst.msk [vmem:[#allocation4 + $0x8] sm:$0xff] %vm1871_vm13, %v1862_v31 }
 0x246   : > { %2023 = vst.msk [vmem:[#allocation4 + $0x8] sm:$0xff] %vm2021_vm15, %v2012_v4  ;;  %v1662_v18 = vpop.permute.xlu0 %1661 }
 0x247   : > { %2068 = vst.msk [vmem:[#allocation4 + $0x8] sm:$0xff] %vm2066_vm0, %v2057_v11 }
 0x248   : > { %2225 = vst.msk [vmem:[#allocation4 + $0x8] sm:$0xff] %vm2223_vm1, %v2214_v61  ;;  %v1664_v14 = vpop.permute.xlu1 %1663 }
 0x249   : > { %1672 = vst.msk [vmem:[#allocation4 + $0x10] sm:$0xff] %vm1669_vm11, %v1662_v18 }
 0x24a   : > { %1717 = vst.msk [vmem:[#allocation4 + $0x10] sm:$0xff] %vm1714_vm12, %v1707_v52  ;;  %v2014_v10 = vpop.permute.xlu0 %2013 }
 0x24c   : > { %v2016_v41 = vpop.permute.xlu1 %2015 }
 0x24e   : > { %v1864_v62 = vpop.permute.xlu0 %1863 }
 0x24f   : > { %v2229_v53 = vld [vmem:[#allocation4 + $0x8] sm:$0xff]  ;;  %1874 = vst.msk [vmem:[#allocation4 + $0x10] sm:$0xff] %vm1871_vm13, %v1864_v62 }
 0x250   : > { %2755 = vmatmul.mubr.msk.bf16.vlgmr.msra.gmra.mrb[0].mxu1 %vm2275_vm3, %v2229_v53  ;;  %2024 = vst.msk [vmem:[#allocation4 + $0x10] sm:$0xff] %vm2021_vm15, %v2014_v10 }
 0x251   : > { %2069 = vst.msk [vmem:[#allocation4 + $0x10] sm:$0xff] %vm2066_vm0, %v2059_v26  ;;  %v1866_v21 = vpop.permute.xlu1 %1865 }
 0x254   : > { %v2216_v39 = vpop.permute.xlu0 %2215 }
 0x255   : > { %2226 = vst.msk [vmem:[#allocation4 + $0x10] sm:$0xff] %vm2223_vm1, %v2216_v39 }
 0x257   : > { %v1515_v7 = vpop.permute.xlu1 %1514 }
 0x258   : > { %1524 = vst.msk [vmem:[#allocation4 + $0x18] sm:$0xff] %vm1520_vm10, %v1515_v7  ;;  %v2366_v57 = vpop.permute.xlu0 %2365 }
 0x259   : > { %1673 = vst.msk [vmem:[#allocation4 + $0x18] sm:$0xff] %vm1669_vm11, %v1664_v14 }
 0x25a   : > { %1718 = vst.msk [vmem:[#allocation4 + $0x18] sm:$0xff] %vm1714_vm12, %v1709_v56 }
 0x25b   : > { %1875 = vst.msk [vmem:[#allocation4 + $0x18] sm:$0xff] %vm1871_vm13, %v1866_v21  ;;  %v2061_v58 = vpop.permute.xlu1 %2060 }
 0x25c   : > { %v2230_v43 = vld [vmem:[#allocation4 + $0x10] sm:$0xff]  ;;  %2025 = vst.msk [vmem:[#allocation4 + $0x18] sm:$0xff] %vm2021_vm15, %v2016_v41  ;;  %v2370_v30 = vpop.permute.xlu0 %2369 }
 0x25d   : > { %2758 = vmatprep.mubr.msk.bf16.mxu1 %vm2275_vm3, %v2230_v43  ;;  %2070 = vst.msk [vmem:[#allocation4 + $0x18] sm:$0xff] %vm2066_vm0, %v2061_v58 }
 0x25f   : > { %v2218_v29 = vpop.permute.xlu1 %2217 }
 0x260   : > { %2227 = vst.msk [vmem:[#allocation4 + $0x18] sm:$0xff] %vm2223_vm1, %v2218_v29  ;;  %v2374_v17 = vpop.permute.xlu0 %2373 }
 0x263   : > { %v2368_v3 = vpop.permute.xlu1 %2367 }
 0x264   : > { %v2378_v38 = vpop.permute.xlu0 %2377 }
 0x267   : > { %v2231_v19 = vld [vmem:[#allocation4 + $0x18] sm:$0xff]  ;;  %v2372_v50 = vpop.permute.xlu1 %2371 }
 0x268   : > { %2759 = vmatmul.mubr.msk.bf16.gmra.mrb[4].mxu1 %vm2275_vm3, %v2231_v19 }
 0x26b   : > { %v2376_v24 = vpop.permute.xlu1 %2375 }
 0x26f   : > { %v2380_v37 = vpop.permute.xlu1 %2379 }
 0x323   : > { %v2756_v33 = vpop.f32.mrb[0].mxu1 }
 0x324   : > { %v2335_v44 = vadd.f32 %v2756_v33, %v2685_v27  ;;  %v2326_v45 = vpop.f32.mrb[1].mxu1 }
 0x325   : > { %v2327_v6 = vadd.f32 %v2685_v27, %v2326_v45  ;;  %v2757_v49 = vpop.f32.mrb[2].mxu1 }
 0x326   : > { %v2391_v48 = vadd.f32 %v2370_v30, %v2335_v44  ;;  %v2338_v55 = vadd.f32 %v2757_v49, %v2685_v27  ;;  %v2329_v36 = vpop.f32.mrb[3].mxu1 }
 0x327   : > { %v2389_v59 = vadd.f32 %v2366_v57, %v2327_v6  ;;  %v2330_v60 = vadd.f32 %v2685_v27, %v2329_v36 }
 0x328   : > { %v2399_v13 = vmax.f32 %v2391_v48, 0.0  ;;  %v2392_v46 = vadd.f32 %v2372_v50, %v2338_v55 }
 0x329   : > { %v2397_v25 = vmax.f32 %v2389_v59, 0.0  ;;  %v2390_v15 = vadd.f32 %v2368_v3, %v2330_v60 }
 0x32a   : > { %v2708_v20 = vpack.c.bf16 %v2399_v13, %v2399_v13  ;;  %v2400_v1 = vmax.f32 %v2392_v46, 0.0 }
 0x32b   : > { %v2706_v47 = vpack.c.bf16 %v2397_v25, %v2397_v25  ;;  %v2398_v54 = vmax.f32 %v2390_v15, 0.0 }
 0x32c   : > { %2439 = vst.msk [vmem:[%s3632_s13 + $0x8] sm:$0xf] %vm1102_vm14, %v2708_v20  ;;  %v2709_v40 = vpack.c.bf16 %v2400_v1, %v2400_v1 }
 0x32d   : > { %2437 = vst.msk [vmem:[%s3632_s13] sm:$0xf] %vm1102_vm14, %v2706_v47  ;;  %v2707_v63 = vpack.c.bf16 %v2398_v54, %v2398_v54 }
 0x32e   : > { %2440 = vst.msk [vmem:[%s3632_s13 + $0xc] sm:$0xf] %vm1102_vm14, %v2709_v40 }
 0x32f   : > { %2438 = vst.msk [vmem:[%s3632_s13 + $0x4] sm:$0xf] %vm1102_vm14, %v2707_v63 }
 0x33b   : > { %v2760_v28 = vpop.f32.mrb[4].mxu1 }
 0x33c   : > { %v2351_v34 = vadd.f32 %v2760_v28, %v2685_v27  ;;  %v2342_v51 = vpop.f32.mrb[5].mxu1 }
 0x33d   : > { %v2343_v32 = vadd.f32 %v2685_v27, %v2342_v51  ;;  %v2761_v16 = vpop.f32.mrb[6].mxu1 }
 0x33e   : > { %v2395_v23 = vadd.f32 %v2378_v38, %v2351_v34  ;;  %v2354_v2 = vadd.f32 %v2761_v16, %v2685_v27  ;;  %v2345_v5 = vpop.f32.mrb[7].mxu1 }
 0x33f   : > { %v2393_v11 = vadd.f32 %v2374_v17, %v2343_v32  ;;  %v2346_v52 = vadd.f32 %v2685_v27, %v2345_v5 }
 0x340   : > { %v2403_v9 = vmax.f32 %v2395_v23, 0.0  ;;  %v2396_v26 = vadd.f32 %v2380_v37, %v2354_v2 }
 0x341   : > { %v2401_v56 = vmax.f32 %v2393_v11, 0.0  ;;  %v2394_v22 = vadd.f32 %v2376_v24, %v2346_v52 }
 0x342   : > { %v2712_v31 = vpack.c.bf16 %v2403_v9, %v2403_v9  ;;  %v2404_v35 = vmax.f32 %v2396_v26, 0.0 }
 0x343   : > { %v2710_v42 = vpack.c.bf16 %v2401_v56, %v2401_v56  ;;  %v2402_v61 = vmax.f32 %v2394_v22, 0.0 }
 0x344   : > { %2443 = vst.msk [vmem:[%s3632_s13 + $0x18] sm:$0xf] %vm1102_vm14, %v2712_v31  ;;  %v2713_v8 = vpack.c.bf16 %v2404_v35, %v2404_v35 }
 0x345   : > { %2441 = vst.msk [vmem:[%s3632_s13 + $0x10] sm:$0xf] %vm1102_vm14, %v2710_v42  ;;  %v2711_v0 = vpack.c.bf16 %v2402_v61, %v2402_v61 }
 0x346   : > { %2444 = vst.msk [vmem:[%s3632_s13 + $0x1c] sm:$0xf] %vm1102_vm14, %v2713_v8 }
 0x347   : > { %2442 = vst.msk [vmem:[%s3632_s13 + $0x14] sm:$0xf] %vm1102_vm14, %v2711_v0 }
 0x348 PF: > { %s15_s18 = sadd.s32 1, %s2837_s18  }
 0x349   : > { %p12_p5 = scmp.ge.s32.totalorder %s15_s18, 4  }
 0x34b   :  { %14 = sbr.rel (!%p12_p5) target bundleno = 1 (0x1), region = 78 }

</bundles_post_ra>
